<compile_context>
chip_gen: v7x
topology: tpu7x:2x2x1
jax: 0.10.0
libtpu: 0.0.40
codegen_flags: <defaults>
</compile_context>

<pallas_src>
import functools

import jax
import jax.numpy as jnp
import numpy as np
from jax.experimental import pallas as pl
from jax.experimental.pallas import tpu as pltpu

C_PAD = 128          # lane-dense channel padding (all real channel counts must be <= 128)


# ----------------------------------------------------------------------------
# Parameter init (PyTorch Conv1d default U(-1/sqrt(fan_in), +1/sqrt(fan_in)))
# ----------------------------------------------------------------------------
def init_conv(key, K, c_in, c_out):
    k1, k2 = jax.random.split(key)
    bound = 1.0 / np.sqrt(c_in * K)
    w = jax.random.uniform(k1, (K, c_in, c_out), minval=-bound, maxval=bound, dtype=jnp.float32)
    b = jax.random.uniform(k2, (c_out,), minval=-bound, maxval=bound, dtype=jnp.float32)
    return w, b


def init_encoder_params(key, *, input_emb_width, output_emb_width, down_t,
                        stride_t, width, depth, dilation_growth_rate):
    keys = jax.random.split(key, 2 + down_t * (1 + 2 * depth))
    ki = iter(keys)
    params = {}
    params["conv_in"] = init_conv(next(ki), 3, input_emb_width, width)
    params["down"] = []
    # Resnet1D builds blocks with dilation = rate**d for d in range(depth), then reverses.
    dilations = [dilation_growth_rate ** d for d in range(depth)][::-1]
    for _ in range(down_t):
        down = {"down_conv": init_conv(next(ki), stride_t * 2, width, width), "res": []}
        for dil in dilations:
            c1 = init_conv(next(ki), 3, width, width)   # dilated 3-tap conv
            c2 = init_conv(next(ki), 1, width, width)   # 1x1 conv
            down["res"].append((dil, c1, c2))
        params["down"].append(down)
    params["conv_out"] = init_conv(next(ki), 3, width, output_emb_width)
    return params


# ----------------------------------------------------------------------------
# Weight packing + static layer program
# ----------------------------------------------------------------------------
def _pad_wb(w, b):
    K, ci, co = w.shape
    assert ci <= C_PAD and co <= C_PAD, (
        f"lane-dense packing needs channel counts <= {C_PAD}, got ({ci}, {co})")
    wp = jnp.zeros((K, C_PAD, C_PAD), jnp.float32).at[:, :ci, :co].set(w)
    bp = jnp.zeros((C_PAD,), jnp.float32).at[:co].set(b)
    return wp.reshape(K * C_PAD, C_PAD), bp


def _is_pointwise(s):
    return s["K"] == 1 and s["stride"] == 1 and s["pad"] == 0 and s["dil"] == 1


def _conv_len(T_in, s):
    return (T_in + 2 * s["pad"] - s["dil"] * (s["K"] - 1) - 1) // s["stride"] + 1


def build_plan(params, *, stride_t, matmul_dtype):
    """Pack all conv weights into one lane-dense slab (pre-cast to the MXU operand dtype)
    and build the static layer program."""
    w_chunks, b_rows, program = [], [], []
    row_off = 0

    def add(wb, *, stride, pad, dil, relu_in, relu_out):
        nonlocal row_off
        w, b = wb
        wp, bp = _pad_wb(w, b)
        spec = dict(w_off=row_off, b_idx=len(b_rows), K=w.shape[0], stride=stride,
                    pad=pad, dil=dil, relu_in=relu_in, relu_out=relu_out)
        w_chunks.append(wp)
        b_rows.append(bp)
        row_off += w.shape[0] * C_PAD
        return spec

    program.append(("conv", add(params["conv_in"], stride=1, pad=1, dil=1,
                                relu_in=False, relu_out=True)))
    for down in params["down"]:
        program.append(("conv", add(down["down_conv"], stride=stride_t, pad=stride_t // 2,
                                    dil=1, relu_in=False, relu_out=False)))
        for dil, c1, c2 in down["res"]:
            s1 = add(c1, stride=1, pad=dil, dil=dil, relu_in=True, relu_out=False)
            s2 = add(c2, stride=1, pad=0, dil=1, relu_in=True, relu_out=False)
            program.append(("res", s1, s2))
    program.append(("conv", add(params["conv_out"], stride=1, pad=1, dil=1,
                                relu_in=False, relu_out=False)))

    W_all = jnp.concatenate(w_chunks, axis=0).astype(matmul_dtype)   # pre-cast ONCE here
    B_all = jnp.stack(b_rows, axis=0)                                # bias stays f32
    # Halo offset: sublane-aligned and large enough for the widest dilated/padded conv.
    max_pad = max(s["pad"] for _, *ss in program for s in ss)
    pad_off = max(8, -(-max_pad // 8) * 8)
    return tuple(program), W_all, B_all, pad_off


def _validate_plan(program, T0, pad_off, n_rows):
    """Walk the static layer program: check halo coverage and return the final length."""
    T = T0
    for op in program:
        specs = op[1:]
        T_in = T
        for s in specs:
            T_out = _conv_len(T_in, s)
            assert T_out >= 1, "sequence too short for this encoder configuration"
            if not _is_pointwise(s):
                assert pad_off >= s["pad"], "front halo smaller than conv padding"
                max_row = pad_off - s["pad"] + s["dil"] * (s["K"] - 1) + s["stride"] * (T_out - 1)
                assert max_row < n_rows, "tail halo smaller than the conv read overrun"
            T_in = T_out
        if op[0] == "res":
            assert T_in == T, "residual branch changed the sequence length"
        else:
            T = T_in
    return T


# ----------------------------------------------------------------------------
# Fused encoder kernel (one grid step per B_blk batch elements, everything in VMEM)
# ----------------------------------------------------------------------------
def _encoder_kernel(x_ref, w_ref, b_ref, o_ref, xpad_ref, *, program, T0, c_in,
                    b_blk, n_rows, pad_off, t_fin, matmul_dtype):
    assert n_rows == 2 * pad_off + T0
    f32 = jnp.float32

    # Zero the front/tail halo rows of every element's staging region.  Done unconditionally
    # each grid step (cheap: 2*pad_off rows per element) so it is also correct when the
    # "parallel" grid axis is sharded across TensorCores (each core's scratch starts stale).
    halo = jnp.zeros((pad_off, C_PAD), f32)
    for b in range(b_blk):
        rb = b * n_rows
        xpad_ref[rb:rb + pad_off, :] = halo
        xpad_ref[rb + pad_off + T0:rb + n_rows, :] = halo

    # Rows [pad_off, pad_off + t_staged) of each element's region may hold non-zero data.
    t_staged = T0

    def conv(x, T_in, spec, *, pre_staged=False):
        """One Conv1d over all b_blk elements as a single (B_blk*T_out, K*C_PAD) x
        (K*C_PAD, C_PAD) MXU matmul.  `x` is the (B_blk*T_in, C_PAD) f32 activation
        (ignored when the input is already staged in the scratch)."""
        nonlocal t_staged
        K, stride, pad, dil = spec["K"], spec["stride"], spec["pad"], spec["dil"]
        T_out = _conv_len(T_in, spec)
        xin = jnp.maximum(x, 0.0) if spec["relu_in"] else x          # ReLU once, not per tap

        if _is_pointwise(spec):
            xt = xin                                                 # 1x1 conv: no tap gather
        else:
            if not pre_staged:
                # Stage the activation into the halo-padded scratch; re-zero the tail only
                # when the sequence length shrank since the last staging (strided convs).
                for b in range(b_blk):
                    rb = b * n_rows + pad_off
                    if t_staged > T_in:
                        xpad_ref[rb + T_in:rb + t_staged, :] = (
                            jnp.zeros((t_staged - T_in, C_PAD), f32))
                    xpad_ref[rb:rb + T_in, :] = xin[b * T_in:(b + 1) * T_in, :]
                t_staged = T_in
            # Gather the K shifted/strided taps with static offsets (no HBM taps tensor) and
            # concatenate them on the lane axis -> one deep MXU matmul per conv.
            rows = []
            for b in range(b_blk):
                rb = b * n_rows + pad_off
                taps = []
                for k in range(K):
                    start = rb - pad + k * dil
                    if stride == 1:
                        taps.append(xpad_ref[pl.ds(start, T_out), :])
                    else:
                        taps.append(xpad_ref[pl.ds(start, T_out, stride), :])
                rows.append(taps[0] if K == 1 else jnp.concatenate(taps, axis=-1))
            xt = rows[0] if b_blk == 1 else jnp.concatenate(rows, axis=0)

        w = w_ref[pl.ds(spec["w_off"], K * C_PAD), :]                # already matmul_dtype
        acc = jnp.dot(xt.astype(matmul_dtype), w, preferred_element_type=jnp.float32)
        acc = acc + b_ref[pl.ds(spec["b_idx"], 1), :]                # bias/ReLU stay f32 (v5e VPU)
        if spec["relu_out"]:
            acc = jnp.maximum(acc, 0.0)
        return acc, T_out

    # conv_in: stage the raw c_in-channel input directly into the scratch.  The lane padding
    # to C_PAD happens here on-chip (zero rows + masked store of the first c_in lanes) so the
    # wrapper never materializes a 128-channel input in HBM.
    for b in range(b_blk):
        rb = b * n_rows + pad_off
        if c_in == C_PAD:
            xpad_ref[rb:rb + T0, :] = x_ref[b].astype(f32)
        else:
            xpad_ref[rb:rb + T0, :] = jnp.zeros((T0, C_PAD), f32)
            xpad_ref[rb:rb + T0, 0:c_in] = x_ref[b].astype(f32)
    x, T_cur = conv(None, T0, program[0][1], pre_staged=True)

    for op in program[1:]:
        if op[0] == "conv":
            x, T_cur = conv(x, T_cur, op[1])
        else:                                                        # Resnet1D block
            h, _ = conv(x, T_cur, op[1])                             # dilated 3-tap conv (pre-ReLU)
            y, _ = conv(h, T_cur, op[2])                             # 1x1 conv (pre-ReLU)
            x = x + y                                                # residual add

    for b in range(b_blk):
        o_ref[b] = x[b * t_fin:(b + 1) * t_fin, :].astype(o_ref.dtype)


# ----------------------------------------------------------------------------
# Wrapper
# ----------------------------------------------------------------------------
def _choose_batch_block(B, T, T_fin):
    """Pick how many batch elements to fold into each grid step (raises the MXU M dim).

    Prefer the smallest divisor of B reaching M = B_blk*T_fin >= 256 (MXU-efficient on
    v6e/v7x, >= 2x the v5e MXU width), subject to B_blk*T <= 512 (keeps the per-conv tap slab
    and the staging scratch small -- comfortably under v7x's 64 MiB VMEM) and to keeping at
    least 2 grid steps so both v7x TensorCores get work on the "parallel" axis."""
    divisors = [d for d in range(1, B + 1) if B % d == 0]
    fits = [d for d in divisors if d * T <= 512] or [1]
    pref = [d for d in fits if B // d >= 2] or fits
    big = [d for d in pref if d * T_fin >= 256]
    return min(big) if big else max(pref)


def encoder_forward(params, x_ncl, *, stride_t, matmul_dtype=jnp.bfloat16, b_blk=None):
    """Fused Pallas forward.  x_ncl: (B, C_in, T) like PyTorch; returns (B, C_out, T_out)."""
    B, c_in, T = x_ncl.shape
    program, W_all, B_all, pad_off = build_plan(params, stride_t=stride_t,
                                                matmul_dtype=matmul_dtype)
    n_rows = 2 * pad_off + T
    T_fin = _validate_plan(program, T, pad_off, n_rows)
    c_out = params["conv_out"][0].shape[2]

    if b_blk is None:
        b_blk = _choose_batch_block(B, T, T_fin)
    assert B % b_blk == 0, "b_blk must divide the batch size"

    # NCL -> NLC.  Channels stay at c_in: the pad to 128 lanes happens inside the kernel.
    x_nlc = jnp.transpose(x_ncl, (0, 2, 1))

    kernel = functools.partial(_encoder_kernel, program=program, T0=T, c_in=c_in,
                               b_blk=b_blk, n_rows=n_rows, pad_off=pad_off, t_fin=T_fin,
                               matmul_dtype=matmul_dtype)

    out = pl.pallas_call(
        kernel,
        out_shape=jax.ShapeDtypeStruct((B, T_fin, C_PAD), jnp.float32),
        grid=(B // b_blk,),
        in_specs=[
            pl.BlockSpec((b_blk, T, c_in), lambda i: (i, 0, 0)),
            # Packed weights/biases: constant index_map -> DMA'd once, resident in VMEM.
            # Total footprint (~2 MB even double-buffered) is far below every generation's
            # scoped-VMEM default, so no vmem_limit_bytes bump / single-buffer override needed.
            pl.BlockSpec(W_all.shape, lambda i: (0, 0)),
            pl.BlockSpec(B_all.shape, lambda i: (0, 0)),
        ],
        out_specs=pl.BlockSpec((b_blk, T_fin, C_PAD), lambda i: (i, 0, 0)),
        scratch_shapes=[pltpu.VMEM((b_blk * n_rows, C_PAD), jnp.float32)],
        compiler_params=pltpu.CompilerParams(dimension_semantics=("parallel",)),
    )(x_nlc, W_all, B_all)

    return jnp.transpose(out[:, :, :c_out], (0, 2, 1))               # NLC -> NCL


# ----------------------------------------------------------------------------
# Pure-JAX reference (lax.conv) for validation
# ----------------------------------------------------------------------------
def _conv1d_ref(x_ncl, w_kio, b, stride=1, dilation=1, pad=0):
    y = jax.lax.conv_general_dilated(
        x_ncl, jnp.transpose(w_kio, (2, 1, 0)), (stride,), [(pad, pad)],
        rhs_dilation=(dilation,), dimension_numbers=("NCH", "OIH", "NCH"))
    return y + b[None, :, None]


def encoder_ref(params, x_ncl, *, stride_t):
    w, b = params["conv_in"]
    x = jax.nn.relu(_conv1d_ref(x_ncl, w, b, pad=1))
    for down in params["down"]:
        w, b = down["down_conv"]
        x = _conv1d_ref(x, w, b, stride=stride_t, pad=stride_t // 2)
        for dil, (w1, b1), (w2, b2) in down["res"]:
            h = _conv1d_ref(jax.nn.relu(x), w1, b1, dilation=dil, pad=dil)
            x = _conv1d_ref(jax.nn.relu(h), w2, b2) + x
    w, b = params["conv_out"]
    return _conv1d_ref(x, w, b, pad=1)


# ----------------------------------------------------------------------------
if __name__ == "__main__":
    cfg = dict(input_emb_width=4, output_emb_width=32, down_t=2, stride_t=2,
               width=32, depth=2, dilation_growth_rate=3)

    key = jax.random.PRNGKey(0)
    kp, kx = jax.random.split(key)
    params = init_encoder_params(kp, **cfg)

    B, C, T = 2, cfg["input_emb_width"], 16
    x = jax.random.normal(kx, (B, C, T), dtype=jnp.float32)          # NCL, like PyTorch

    # f32 matmul path (exact check against the lax.conv reference).
    out = encoder_forward(params, x, stride_t=cfg["stride_t"], matmul_dtype=jnp.float32)
    out = jax.block_until_ready(out)
    ref = encoder_ref(params, x, stride_t=cfg["stride_t"])
    np.testing.assert_allclose(np.asarray(out), np.asarray(ref), atol=1e-4, rtol=1e-4)
    assert out.shape == (B, cfg["output_emb_width"], T // (cfg["stride_t"] ** cfg["down_t"]))

    # Default path: bf16 MXU operands (pre-cast packed weights) with f32 accumulation.
    out_bf16 = jax.block_until_ready(
        encoder_forward(params, x, stride_t=cfg["stride_t"]))
    np.testing.assert_allclose(np.asarray(out_bf16), np.asarray(ref), atol=5e-2, rtol=5e-2)

    print("KERNEL_OK")
</pallas_src>

<mosaic_0001>
module attributes {stable_mosaic.version = 11 : i64} {
  func.func @_encoder_kernel(%arg0: i32, %arg1: memref<1x16x4xf32, #tpu.memory_space<vmem>>, %arg2: memref<3840x128xf32, #tpu.memory_space<vmem>>, %arg3: memref<12x128xf32, #tpu.memory_space<vmem>>, %arg4: memref<1x4x128xf32, #tpu.memory_space<vmem>>, %arg5: memref<32x128xf32, #tpu.memory_space<vmem>>) attributes {dimension_semantics = [#tpu.dimension_semantics<parallel>], iteration_bounds = array<i64: 2>, scalar_prefetch = 0 : i64, scratch_operands = 1 : i64, tpu.core_type = #tpu.core_type<tc>, window_params = [{transform_indices = @transform_0, window_bounds = array<i64: 1, 16, 4>}, {pipeline_mode = #tpu.pipeline_mode<synchronous>, transform_indices = @transform_1, window_bounds = array<i64: 3840, 128>}, {pipeline_mode = #tpu.pipeline_mode<synchronous>, transform_indices = @transform_2, window_bounds = array<i64: 12, 128>}, {transform_indices = @transform_3, window_bounds = array<i64: 1, 4, 128>}]} {
    %cst = arith.constant 0.000000e+00 : f32
    %0 = vector.broadcast %cst : f32 to vector<8x128xf32>
    %c0 = arith.constant 0 : index
    %c0_0 = arith.constant 0 : index
    %1 = vector.load %arg5[%c0, %c0_0] : memref<32x128xf32, #tpu.memory_space<vmem>>, vector<8x128xf32>
    tpu.vector_store %arg5[%c0, %c0_0], %0 {strides = array<i32>} : memref<32x128xf32, #tpu.memory_space<vmem>>, vector<8x128xf32>,
    %c24 = arith.constant 24 : index
    %c0_1 = arith.constant 0 : index
    %2 = vector.load %arg5[%c24, %c0_1] : memref<32x128xf32, #tpu.memory_space<vmem>>, vector<8x128xf32>
    tpu.vector_store %arg5[%c24, %c0_1], %0 {strides = array<i32>} : memref<32x128xf32, #tpu.memory_space<vmem>>, vector<8x128xf32>,
    %cst_2 = arith.constant 0.000000e+00 : f32
    %3 = vector.broadcast %cst_2 : f32 to vector<16x128xf32>
    %c8 = arith.constant 8 : index
    %c0_3 = arith.constant 0 : index
    %4 = vector.load %arg5[%c8, %c0_3] : memref<32x128xf32, #tpu.memory_space<vmem>>, vector<16x128xf32>
    tpu.vector_store %arg5[%c8, %c0_3], %3 {strides = array<i32>} : memref<32x128xf32, #tpu.memory_space<vmem>>, vector<16x128xf32>,
    %c0_4 = arith.constant 0 : index
    %c0_5 = arith.constant 0 : index
    %c0_6 = arith.constant 0 : index
    %5 = vector.load %arg1[%c0_4, %c0_5, %c0_6] : memref<1x16x4xf32, #tpu.memory_space<vmem>>, vector<1x16x4xf32>
    %6 = vector.shape_cast %5 : vector<1x16x4xf32> to vector<16x4xf32>
    %c8_7 = arith.constant 8 : index
    %c0_8 = arith.constant 0 : index
    %7 = vector.load %arg5[%c8_7, %c0_8] : memref<32x128xf32, #tpu.memory_space<vmem>>, vector<16x4xf32>
    tpu.vector_store %arg5[%c8_7, %c0_8], %6 {strides = array<i32>} : memref<32x128xf32, #tpu.memory_space<vmem>>, vector<16x4xf32>,
    %c7 = arith.constant 7 : index
    %c0_9 = arith.constant 0 : index
    %8 = vector.load %arg5[%c7, %c0_9] : memref<32x128xf32, #tpu.memory_space<vmem>>, vector<16x128xf32>
    %c8_10 = arith.constant 8 : index
    %c0_11 = arith.constant 0 : index
    %9 = vector.load %arg5[%c8_10, %c0_11] : memref<32x128xf32, #tpu.memory_space<vmem>>, vector<16x128xf32>
    %c9 = arith.constant 9 : index
    %c0_12 = arith.constant 0 : index
    %10 = vector.load %arg5[%c9, %c0_12] : memref<32x128xf32, #tpu.memory_space<vmem>>, vector<16x128xf32>
    %11 = tpu.concatenate %8, %9, %10 in 1 : vector<16x128xf32>, vector<16x128xf32>, vector<16x128xf32> -> vector<16x384xf32>
    %c0_13 = arith.constant 0 : index
    %c0_14 = arith.constant 0 : index
    %12 = vector.load %arg2[%c0_13, %c0_14] : memref<3840x128xf32, #tpu.memory_space<vmem>>, vector<384x128xf32>
    %cst_15 = arith.constant dense<0.000000e+00> : vector<16x128xf32>
    %13 = tpu.matmul %11, %12, %cst_15 {dimension_numbers = #tpu.dot_dimension_numbers<[1], [0], [0], [1], [0, 0, 1, 1], [], []>} : vector<16x384xf32>, vector<384x128xf32>, vector<16x128xf32> -> vector<16x128xf32>
    %c0_16 = arith.constant 0 : index
    %c0_17 = arith.constant 0 : index
    %14 = vector.load %arg3[%c0_16, %c0_17] : memref<12x128xf32, #tpu.memory_space<vmem>>, vector<1x128xf32>
    %15 = vector.broadcast %14 : vector<1x128xf32> to vector<16x128xf32>
    %16 = arith.addf %13, %15 : vector<16x128xf32>
    %cst_18 = arith.constant 0.000000e+00 : f32
    %17 = vector.broadcast %cst_18 : f32 to vector<16x128xf32>
    %18 = arith.maximumf %16, %17 : vector<16x128xf32>
    %c8_19 = arith.constant 8 : index
    %c0_20 = arith.constant 0 : index
    %19 = vector.load %arg5[%c8_19, %c0_20] : memref<32x128xf32, #tpu.memory_space<vmem>>, vector<16x128xf32>
    tpu.vector_store %arg5[%c8_19, %c0_20], %18 {strides = array<i32>} : memref<32x128xf32, #tpu.memory_space<vmem>>, vector<16x128xf32>,
    %c7_21 = arith.constant 7 : index
    %c0_22 = arith.constant 0 : index
    %20 = tpu.strided_load %arg5[%c7_21, %c0_22] {strides = array<i32: 2, 1>} : memref<32x128xf32, #tpu.memory_space<vmem>>, vector<8x128xf32>
    %c8_23 = arith.constant 8 : index
    %c0_24 = arith.constant 0 : index
    %21 = tpu.strided_load %arg5[%c8_23, %c0_24] {strides = array<i32: 2, 1>} : memref<32x128xf32, #tpu.memory_space<vmem>>, vector<8x128xf32>
    %c9_25 = arith.constant 9 : index
    %c0_26 = arith.constant 0 : index
    %22 = tpu.strided_load %arg5[%c9_25, %c0_26] {strides = array<i32: 2, 1>} : memref<32x128xf32, #tpu.memory_space<vmem>>, vector<8x128xf32>
    %c10 = arith.constant 10 : index
    %c0_27 = arith.constant 0 : index
    %23 = tpu.strided_load %arg5[%c10, %c0_27] {strides = array<i32: 2, 1>} : memref<32x128xf32, #tpu.memory_space<vmem>>, vector<8x128xf32>
    %24 = tpu.concatenate %20, %21, %22, %23 in 1 : vector<8x128xf32>, vector<8x128xf32>, vector<8x128xf32>, vector<8x128xf32> -> vector<8x512xf32>
    %c384 = arith.constant 384 : index
    %c0_28 = arith.constant 0 : index
    %25 = vector.load %arg2[%c384, %c0_28] : memref<3840x128xf32, #tpu.memory_space<vmem>>, vector<512x128xf32>
    %cst_29 = arith.constant dense<0.000000e+00> : vector<8x128xf32>
    %26 = tpu.matmul %24, %25, %cst_29 {dimension_numbers = #tpu.dot_dimension_numbers<[1], [0], [0], [1], [0, 0, 1, 1], [], []>} : vector<8x512xf32>, vector<512x128xf32>, vector<8x128xf32> -> vector<8x128xf32>
    %c1 = arith.constant 1 : index
    %c0_30 = arith.constant 0 : index
    %27 = vector.load %arg3[%c1, %c0_30] : memref<12x128xf32, #tpu.memory_space<vmem>>, vector<1x128xf32>
    %28 = vector.broadcast %27 : vector<1x128xf32> to vector<8x128xf32>
    %29 = arith.addf %26, %28 : vector<8x128xf32>
    %cst_31 = arith.constant 0.000000e+00 : f32
    %30 = vector.broadcast %cst_31 : f32 to vector<8x128xf32>
    %31 = arith.maximumf %29, %30 : vector<8x128xf32>
    %cst_32 = arith.constant 0.000000e+00 : f32
    %32 = vector.broadcast %cst_32 : f32 to vector<8x128xf32>
    %c16 = arith.constant 16 : index
    %c0_33 = arith.constant 0 : index
    %33 = vector.load %arg5[%c16, %c0_33] : memref<32x128xf32, #tpu.memory_space<vmem>>, vector<8x128xf32>
    tpu.vector_store %arg5[%c16, %c0_33], %32 {strides = array<i32>} : memref<32x128xf32, #tpu.memory_space<vmem>>, vector<8x128xf32>,
    %c8_34 = arith.constant 8 : index
    %c0_35 = arith.constant 0 : index
    %34 = vector.load %arg5[%c8_34, %c0_35] : memref<32x128xf32, #tpu.memory_space<vmem>>, vector<8x128xf32>
    tpu.vector_store %arg5[%c8_34, %c0_35], %31 {strides = array<i32>} : memref<32x128xf32, #tpu.memory_space<vmem>>, vector<8x128xf32>,
    %c5 = arith.constant 5 : index
    %c0_36 = arith.constant 0 : index
    %35 = vector.load %arg5[%c5, %c0_36] : memref<32x128xf32, #tpu.memory_space<vmem>>, vector<8x128xf32>
    %c8_37 = arith.constant 8 : index
    %c0_38 = arith.constant 0 : index
    %36 = vector.load %arg5[%c8_37, %c0_38] : memref<32x128xf32, #tpu.memory_space<vmem>>, vector<8x128xf32>
    %c11 = arith.constant 11 : index
    %c0_39 = arith.constant 0 : index
    %37 = vector.load %arg5[%c11, %c0_39] : memref<32x128xf32, #tpu.memory_space<vmem>>, vector<8x128xf32>
    %38 = tpu.concatenate %35, %36, %37 in 1 : vector<8x128xf32>, vector<8x128xf32>, vector<8x128xf32> -> vector<8x384xf32>
    %c896 = arith.constant 896 : index
    %c0_40 = arith.constant 0 : index
    %39 = vector.load %arg2[%c896, %c0_40] : memref<3840x128xf32, #tpu.memory_space<vmem>>, vector<384x128xf32>
    %cst_41 = arith.constant dense<0.000000e+00> : vector<8x128xf32>
    %40 = tpu.matmul %38, %39, %cst_41 {dimension_numbers = #tpu.dot_dimension_numbers<[1], [0], [0], [1], [0, 0, 1, 1], [], []>} : vector<8x384xf32>, vector<384x128xf32>, vector<8x128xf32> -> vector<8x128xf32>
    %c2 = arith.constant 2 : index
    %c0_42 = arith.constant 0 : index
    %41 = vector.load %arg3[%c2, %c0_42] : memref<12x128xf32, #tpu.memory_space<vmem>>, vector<1x128xf32>
    %42 = vector.broadcast %41 : vector<1x128xf32> to vector<8x128xf32>
    %43 = arith.addf %40, %42 : vector<8x128xf32>
    %cst_43 = arith.constant 0.000000e+00 : f32
    %44 = vector.broadcast %cst_43 : f32 to vector<8x128xf32>
    %45 = arith.maximumf %43, %44 : vector<8x128xf32>
    %c1280 = arith.constant 1280 : index
    %c0_44 = arith.constant 0 : index
    %46 = vector.load %arg2[%c1280, %c0_44] : memref<3840x128xf32, #tpu.memory_space<vmem>>, vector<128x128xf32>
    %cst_45 = arith.constant dense<0.000000e+00> : vector<8x128xf32>
    %47 = tpu.matmul %45, %46, %cst_45 {dimension_numbers = #tpu.dot_dimension_numbers<[1], [0], [0], [1], [0, 0, 1, 1], [], []>} : vector<8x128xf32>, vector<128x128xf32>, vector<8x128xf32> -> vector<8x128xf32>
    %c3 = arith.constant 3 : index
    %c0_46 = arith.constant 0 : index
    %48 = vector.load %arg3[%c3, %c0_46] : memref<12x128xf32, #tpu.memory_space<vmem>>, vector<1x128xf32>
    %49 = vector.broadcast %48 : vector<1x128xf32> to vector<8x128xf32>
    %50 = arith.addf %47, %49 : vector<8x128xf32>
    %51 = arith.addf %29, %50 : vector<8x128xf32>
    %cst_47 = arith.constant 0.000000e+00 : f32
    %52 = vector.broadcast %cst_47 : f32 to vector<8x128xf32>
    %53 = arith.maximumf %51, %52 : vector<8x128xf32>
    %c8_48 = arith.constant 8 : index
    %c0_49 = arith.constant 0 : index
    %54 = vector.load %arg5[%c8_48, %c0_49] : memref<32x128xf32, #tpu.memory_space<vmem>>, vector<8x128xf32>
    tpu.vector_store %arg5[%c8_48, %c0_49], %53 {strides = array<i32>} : memref<32x128xf32, #tpu.memory_space<vmem>>, vector<8x128xf32>,
    %c7_50 = arith.constant 7 : index
    %c0_51 = arith.constant 0 : index
    %55 = vector.load %arg5[%c7_50, %c0_51] : memref<32x128xf32, #tpu.memory_space<vmem>>, vector<8x128xf32>
    %c8_52 = arith.constant 8 : index
    %c0_53 = arith.constant 0 : index
    %56 = vector.load %arg5[%c8_52, %c0_53] : memref<32x128xf32, #tpu.memory_space<vmem>>, vector<8x128xf32>
    %c9_54 = arith.constant 9 : index
    %c0_55 = arith.constant 0 : index
    %57 = vector.load %arg5[%c9_54, %c0_55] : memref<32x128xf32, #tpu.memory_space<vmem>>, vector<8x128xf32>
    %58 = tpu.concatenate %55, %56, %57 in 1 : vector<8x128xf32>, vector<8x128xf32>, vector<8x128xf32> -> vector<8x384xf32>
    %c1408 = arith.constant 1408 : index
    %c0_56 = arith.constant 0 : index
    %59 = vector.load %arg2[%c1408, %c0_56] : memref<3840x128xf32, #tpu.memory_space<vmem>>, vector<384x128xf32>
    %cst_57 = arith.constant dense<0.000000e+00> : vector<8x128xf32>
    %60 = tpu.matmul %58, %59, %cst_57 {dimension_numbers = #tpu.dot_dimension_numbers<[1], [0], [0], [1], [0, 0, 1, 1], [], []>} : vector<8x384xf32>, vector<384x128xf32>, vector<8x128xf32> -> vector<8x128xf32>
    %c4 = arith.constant 4 : index
    %c0_58 = arith.constant 0 : index
    %61 = vector.load %arg3[%c4, %c0_58] : memref<12x128xf32, #tpu.memory_space<vmem>>, vector<1x128xf32>
    %62 = vector.broadcast %61 : vector<1x128xf32> to vector<8x128xf32>
    %63 = arith.addf %60, %62 : vector<8x128xf32>
    %cst_59 = arith.constant 0.000000e+00 : f32
    %64 = vector.broadcast %cst_59 : f32 to vector<8x128xf32>
    %65 = arith.maximumf %63, %64 : vector<8x128xf32>
    %c1792 = arith.constant 1792 : index
    %c0_60 = arith.constant 0 : index
    %66 = vector.load %arg2[%c1792, %c0_60] : memref<3840x128xf32, #tpu.memory_space<vmem>>, vector<128x128xf32>
    %cst_61 = arith.constant dense<0.000000e+00> : vector<8x128xf32>
    %67 = tpu.matmul %65, %66, %cst_61 {dimension_numbers = #tpu.dot_dimension_numbers<[1], [0], [0], [1], [0, 0, 1, 1], [], []>} : vector<8x128xf32>, vector<128x128xf32>, vector<8x128xf32> -> vector<8x128xf32>
    %c5_62 = arith.constant 5 : index
    %c0_63 = arith.constant 0 : index
    %68 = vector.load %arg3[%c5_62, %c0_63] : memref<12x128xf32, #tpu.memory_space<vmem>>, vector<1x128xf32>
    %69 = vector.broadcast %68 : vector<1x128xf32> to vector<8x128xf32>
    %70 = arith.addf %67, %69 : vector<8x128xf32>
    %71 = arith.addf %51, %70 : vector<8x128xf32>
    %c8_64 = arith.constant 8 : index
    %c0_65 = arith.constant 0 : index
    %72 = vector.load %arg5[%c8_64, %c0_65] : memref<32x128xf32, #tpu.memory_space<vmem>>, vector<8x128xf32>
    tpu.vector_store %arg5[%c8_64, %c0_65], %71 {strides = array<i32>} : memref<32x128xf32, #tpu.memory_space<vmem>>, vector<8x128xf32>,
    %c7_66 = arith.constant 7 : index
    %c0_67 = arith.constant 0 : index
    %73 = tpu.strided_load %arg5[%c7_66, %c0_67] {strides = array<i32: 2, 1>} : memref<32x128xf32, #tpu.memory_space<vmem>>, vector<4x128xf32>
    %c8_68 = arith.constant 8 : index
    %c0_69 = arith.constant 0 : index
    %74 = tpu.strided_load %arg5[%c8_68, %c0_69] {strides = array<i32: 2, 1>} : memref<32x128xf32, #tpu.memory_space<vmem>>, vector<4x128xf32>
    %c9_70 = arith.constant 9 : index
    %c0_71 = arith.constant 0 : index
    %75 = tpu.strided_load %arg5[%c9_70, %c0_71] {strides = array<i32: 2, 1>} : memref<32x128xf32, #tpu.memory_space<vmem>>, vector<4x128xf32>
    %c10_72 = arith.constant 10 : index
    %c0_73 = arith.constant 0 : index
    %76 = tpu.strided_load %arg5[%c10_72, %c0_73] {strides = array<i32: 2, 1>} : memref<32x128xf32, #tpu.memory_space<vmem>>, vector<4x128xf32>
    %77 = tpu.concatenate %73, %74, %75, %76 in 1 : vector<4x128xf32>, vector<4x128xf32>, vector<4x128xf32>, vector<4x128xf32> -> vector<4x512xf32>
    %c1920 = arith.constant 1920 : index
    %c0_74 = arith.constant 0 : index
    %78 = vector.load %arg2[%c1920, %c0_74] : memref<3840x128xf32, #tpu.memory_space<vmem>>, vector<512x128xf32>
    %cst_75 = arith.constant dense<0.000000e+00> : vector<4x128xf32>
    %79 = tpu.matmul %77, %78, %cst_75 {dimension_numbers = #tpu.dot_dimension_numbers<[1], [0], [0], [1], [0, 0, 1, 1], [], []>} : vector<4x512xf32>, vector<512x128xf32>, vector<4x128xf32> -> vector<4x128xf32>
    %c6 = arith.constant 6 : index
    %c0_76 = arith.constant 0 : index
    %80 = vector.load %arg3[%c6, %c0_76] : memref<12x128xf32, #tpu.memory_space<vmem>>, vector<1x128xf32>
    %81 = vector.broadcast %80 : vector<1x128xf32> to vector<4x128xf32>
    %82 = arith.addf %79, %81 : vector<4x128xf32>
    %cst_77 = arith.constant 0.000000e+00 : f32
    %83 = vector.broadcast %cst_77 : f32 to vector<4x128xf32>
    %84 = arith.maximumf %82, %83 : vector<4x128xf32>
    %cst_78 = arith.constant 0.000000e+00 : f32
    %85 = vector.broadcast %cst_78 : f32 to vector<4x128xf32>
    %c12 = arith.constant 12 : index
    %c0_79 = arith.constant 0 : index
    %86 = vector.load %arg5[%c12, %c0_79] : memref<32x128xf32, #tpu.memory_space<vmem>>, vector<4x128xf32>
    tpu.vector_store %arg5[%c12, %c0_79], %85 {strides = array<i32>} : memref<32x128xf32, #tpu.memory_space<vmem>>, vector<4x128xf32>,
    %c8_80 = arith.constant 8 : index
    %c0_81 = arith.constant 0 : index
    %87 = vector.load %arg5[%c8_80, %c0_81] : memref<32x128xf32, #tpu.memory_space<vmem>>, vector<4x128xf32>
    tpu.vector_store %arg5[%c8_80, %c0_81], %84 {strides = array<i32>} : memref<32x128xf32, #tpu.memory_space<vmem>>, vector<4x128xf32>,
    %c5_82 = arith.constant 5 : index
    %c0_83 = arith.constant 0 : index
    %88 = vector.load %arg5[%c5_82, %c0_83] : memref<32x128xf32, #tpu.memory_space<vmem>>, vector<4x128xf32>
    %c8_84 = arith.constant 8 : index
    %c0_85 = arith.constant 0 : index
    %89 = vector.load %arg5[%c8_84, %c0_85] : memref<32x128xf32, #tpu.memory_space<vmem>>, vector<4x128xf32>
    %c11_86 = arith.constant 11 : index
    %c0_87 = arith.constant 0 : index
    %90 = vector.load %arg5[%c11_86, %c0_87] : memref<32x128xf32, #tpu.memory_space<vmem>>, vector<4x128xf32>
    %91 = tpu.concatenate %88, %89, %90 in 1 : vector<4x128xf32>, vector<4x128xf32>, vector<4x128xf32> -> vector<4x384xf32>
    %c2432 = arith.constant 2432 : index
    %c0_88 = arith.constant 0 : index
    %92 = vector.load %arg2[%c2432, %c0_88] : memref<3840x128xf32, #tpu.memory_space<vmem>>, vector<384x128xf32>
    %cst_89 = arith.constant dense<0.000000e+00> : vector<4x128xf32>
    %93 = tpu.matmul %91, %92, %cst_89 {dimension_numbers = #tpu.dot_dimension_numbers<[1], [0], [0], [1], [0, 0, 1, 1], [], []>} : vector<4x384xf32>, vector<384x128xf32>, vector<4x128xf32> -> vector<4x128xf32>
    %c7_90 = arith.constant 7 : index
    %c0_91 = arith.constant 0 : index
    %94 = vector.load %arg3[%c7_90, %c0_91] : memref<12x128xf32, #tpu.memory_space<vmem>>, vector<1x128xf32>
    %95 = vector.broadcast %94 : vector<1x128xf32> to vector<4x128xf32>
    %96 = arith.addf %93, %95 : vector<4x128xf32>
    %cst_92 = arith.constant 0.000000e+00 : f32
    %97 = vector.broadcast %cst_92 : f32 to vector<4x128xf32>
    %98 = arith.maximumf %96, %97 : vector<4x128xf32>
    %c2816 = arith.constant 2816 : index
    %c0_93 = arith.constant 0 : index
    %99 = vector.load %arg2[%c2816, %c0_93] : memref<3840x128xf32, #tpu.memory_space<vmem>>, vector<128x128xf32>
    %cst_94 = arith.constant dense<0.000000e+00> : vector<4x128xf32>
    %100 = tpu.matmul %98, %99, %cst_94 {dimension_numbers = #tpu.dot_dimension_numbers<[1], [0], [0], [1], [0, 0, 1, 1], [], []>} : vector<4x128xf32>, vector<128x128xf32>, vector<4x128xf32> -> vector<4x128xf32>
    %c8_95 = arith.constant 8 : index
    %c0_96 = arith.constant 0 : index
    %101 = vector.load %arg3[%c8_95, %c0_96] : memref<12x128xf32, #tpu.memory_space<vmem>>, vector<1x128xf32>
    %102 = vector.broadcast %101 : vector<1x128xf32> to vector<4x128xf32>
    %103 = arith.addf %100, %102 : vector<4x128xf32>
    %104 = arith.addf %82, %103 : vector<4x128xf32>
    %cst_97 = arith.constant 0.000000e+00 : f32
    %105 = vector.broadcast %cst_97 : f32 to vector<4x128xf32>
    %106 = arith.maximumf %104, %105 : vector<4x128xf32>
    %c8_98 = arith.constant 8 : index
    %c0_99 = arith.constant 0 : index
    %107 = vector.load %arg5[%c8_98, %c0_99] : memref<32x128xf32, #tpu.memory_space<vmem>>, vector<4x128xf32>
    tpu.vector_store %arg5[%c8_98, %c0_99], %106 {strides = array<i32>} : memref<32x128xf32, #tpu.memory_space<vmem>>, vector<4x128xf32>,
    %c7_100 = arith.constant 7 : index
    %c0_101 = arith.constant 0 : index
    %108 = vector.load %arg5[%c7_100, %c0_101] : memref<32x128xf32, #tpu.memory_space<vmem>>, vector<4x128xf32>
    %c8_102 = arith.constant 8 : index
    %c0_103 = arith.constant 0 : index
    %109 = vector.load %arg5[%c8_102, %c0_103] : memref<32x128xf32, #tpu.memory_space<vmem>>, vector<4x128xf32>
    %c9_104 = arith.constant 9 : index
    %c0_105 = arith.constant 0 : index
    %110 = vector.load %arg5[%c9_104, %c0_105] : memref<32x128xf32, #tpu.memory_space<vmem>>, vector<4x128xf32>
    %111 = tpu.concatenate %108, %109, %110 in 1 : vector<4x128xf32>, vector<4x128xf32>, vector<4x128xf32> -> vector<4x384xf32>
    %c2944 = arith.constant 2944 : index
    %c0_106 = arith.constant 0 : index
    %112 = vector.load %arg2[%c2944, %c0_106] : memref<3840x128xf32, #tpu.memory_space<vmem>>, vector<384x128xf32>
    %cst_107 = arith.constant dense<0.000000e+00> : vector<4x128xf32>
    %113 = tpu.matmul %111, %112, %cst_107 {dimension_numbers = #tpu.dot_dimension_numbers<[1], [0], [0], [1], [0, 0, 1, 1], [], []>} : vector<4x384xf32>, vector<384x128xf32>, vector<4x128xf32> -> vector<4x128xf32>
    %c9_108 = arith.constant 9 : index
    %c0_109 = arith.constant 0 : index
    %114 = vector.load %arg3[%c9_108, %c0_109] : memref<12x128xf32, #tpu.memory_space<vmem>>, vector<1x128xf32>
    %115 = vector.broadcast %114 : vector<1x128xf32> to vector<4x128xf32>
    %116 = arith.addf %113, %115 : vector<4x128xf32>
    %cst_110 = arith.constant 0.000000e+00 : f32
    %117 = vector.broadcast %cst_110 : f32 to vector<4x128xf32>
    %118 = arith.maximumf %116, %117 : vector<4x128xf32>
    %c3328 = arith.constant 3328 : index
    %c0_111 = arith.constant 0 : index
    %119 = vector.load %arg2[%c3328, %c0_111] : memref<3840x128xf32, #tpu.memory_space<vmem>>, vector<128x128xf32>
    %cst_112 = arith.constant dense<0.000000e+00> : vector<4x128xf32>
    %120 = tpu.matmul %118, %119, %cst_112 {dimension_numbers = #tpu.dot_dimension_numbers<[1], [0], [0], [1], [0, 0, 1, 1], [], []>} : vector<4x128xf32>, vector<128x128xf32>, vector<4x128xf32> -> vector<4x128xf32>
    %c10_113 = arith.constant 10 : index
    %c0_114 = arith.constant 0 : index
    %121 = vector.load %arg3[%c10_113, %c0_114] : memref<12x128xf32, #tpu.memory_space<vmem>>, vector<1x128xf32>
    %122 = vector.broadcast %121 : vector<1x128xf32> to vector<4x128xf32>
    %123 = arith.addf %120, %122 : vector<4x128xf32>
    %124 = arith.addf %104, %123 : vector<4x128xf32>
    %c8_115 = arith.constant 8 : index
    %c0_116 = arith.constant 0 : index
    %125 = vector.load %arg5[%c8_115, %c0_116] : memref<32x128xf32, #tpu.memory_space<vmem>>, vector<4x128xf32>
    tpu.vector_store %arg5[%c8_115, %c0_116], %124 {strides = array<i32>} : memref<32x128xf32, #tpu.memory_space<vmem>>, vector<4x128xf32>,
    %c7_117 = arith.constant 7 : index
    %c0_118 = arith.constant 0 : index
    %126 = vector.load %arg5[%c7_117, %c0_118] : memref<32x128xf32, #tpu.memory_space<vmem>>, vector<4x128xf32>
    %c8_119 = arith.constant 8 : index
    %c0_120 = arith.constant 0 : index
    %127 = vector.load %arg5[%c8_119, %c0_120] : memref<32x128xf32, #tpu.memory_space<vmem>>, vector<4x128xf32>
    %c9_121 = arith.constant 9 : index
    %c0_122 = arith.constant 0 : index
    %128 = vector.load %arg5[%c9_121, %c0_122] : memref<32x128xf32, #tpu.memory_space<vmem>>, vector<4x128xf32>
    %129 = tpu.concatenate %126, %127, %128 in 1 : vector<4x128xf32>, vector<4x128xf32>, vector<4x128xf32> -> vector<4x384xf32>
    %c3456 = arith.constant 3456 : index
    %c0_123 = arith.constant 0 : index
    %130 = vector.load %arg2[%c3456, %c0_123] : memref<3840x128xf32, #tpu.memory_space<vmem>>, vector<384x128xf32>
    %cst_124 = arith.constant dense<0.000000e+00> : vector<4x128xf32>
    %131 = tpu.matmul %129, %130, %cst_124 {dimension_numbers = #tpu.dot_dimension_numbers<[1], [0], [0], [1], [0, 0, 1, 1], [], []>} : vector<4x384xf32>, vector<384x128xf32>, vector<4x128xf32> -> vector<4x128xf32>
    %c11_125 = arith.constant 11 : index
    %c0_126 = arith.constant 0 : index
    %132 = vector.load %arg3[%c11_125, %c0_126] : memref<12x128xf32, #tpu.memory_space<vmem>>, vector<1x128xf32>
    %133 = vector.broadcast %132 : vector<1x128xf32> to vector<4x128xf32>
    %134 = arith.addf %131, %133 : vector<4x128xf32>
    %c0_127 = arith.constant 0 : index
    %c0_128 = arith.constant 0 : index
    %c0_129 = arith.constant 0 : index
    %135 = vector.load %arg4[%c0_127, %c0_128, %c0_129] : memref<1x4x128xf32, #tpu.memory_space<vmem>>, vector<1x4x128xf32>
    %136 = vector.shape_cast %135 : vector<1x4x128xf32> to vector<4x128xf32>
    %137 = vector.shape_cast %134 : vector<4x128xf32> to vector<1x4x128xf32>
    tpu.vector_store %arg4[%c0_127, %c0_128, %c0_129], %137 {strides = array<i32>} : memref<1x4x128xf32, #tpu.memory_space<vmem>>, vector<1x4x128xf32>,
    return
  }
  func.func @transform_0(%arg0: i32) -> (i32, i32, i32) {
    %c0_i32 = arith.constant 0 : i32
    %c0_i32_0 = arith.constant 0 : i32
    %c0_i32_1 = arith.constant 0 : i32
    return %arg0, %c0_i32, %c0_i32_0 : i32, i32, i32
  }
  func.func @transform_1(%arg0: i32) -> (i32, i32) {
    %c0_i32 = arith.constant 0 : i32
    %c0_i32_0 = arith.constant 0 : i32
    %c0_i32_1 = arith.constant 0 : i32
    return %c0_i32, %c0_i32_0 : i32, i32
  }
  func.func @transform_2(%arg0: i32) -> (i32, i32) {
    %c0_i32 = arith.constant 0 : i32
    %c0_i32_0 = arith.constant 0 : i32
    %c0_i32_1 = arith.constant 0 : i32
    return %c0_i32, %c0_i32_0 : i32, i32
  }
  func.func @transform_3(%arg0: i32) -> (i32, i32, i32) {
    %c0_i32 = arith.constant 0 : i32
    %c0_i32_0 = arith.constant 0 : i32
    %c0_i32_1 = arith.constant 0 : i32
    return %arg0, %c0_i32, %c0_i32_0 : i32, i32, i32
  }
}

</mosaic_0001>

<bundles_post_ra>
// kernel: tpu_custom_call.1
= control target key start
LH: loop header
LB: loop body
LE: loop exit
PB: predicated region body
PF: predicated region fallthrough
CT: control target
= control target key end

     0   :  { %8 = vsyncpa [#allocation4], 0  ;;  %s4293_s0 = inlined_call_operand.vmem [shape: f32[2,16,4], index: 0, kind: input, shape index: {}]   ;;  %s4294_s1 = inlined_call_operand.hbm [shape: f32[3840,128], index: 1, kind: input, shape index: {}]   ;;  %s4295_s2 = inlined_call_operand.hbm [shape: f32[12,128], index: 2, kind: input, shape index: {}]   ;;  %s4296_s3 = inlined_call_operand.hbm [shape: f32[2,4,128], index: 3, kind: output, shape index: {}]  }
   0x1   :  { %9 = vsyncpa [#allocation7], 0 }
   0x2   :  { %10 = vsyncpa [#allocation5], 0 }
   0x3   :  { %12 = vsyncpa [#allocation5 + $0x1], 0  ;;  %s4004_s12 = smov 0   ;;  %s4006_s13 = smov 0  }
   0x4   :  { %s4008_s14 = smov 0   ;;  %s4010_s15 = smov 0  }
   0x5 LB: > { %s4025_s16 = sadd.s32 4294967295, %s3974_s15   ;;  %s2311_s17 = sadd.s32 4294967294, %s3974_s15   ;;  %s3974_s15 = sphi %s4010_s15, %s4314_s15   ;;  %s3970_s14 = sphi %s4008_s14, %s4313_s14   ;;  %s3966_s13 = sphi %s4006_s13, %s4312_s13   ;;  %s3962_s12 = sphi %s4004_s12, %s4311_s12  }
   0x6   : > { %s4029_s18 = sadd.s32 1, %s3974_s15   ;;  %s93_s19 = sadd.s32 1, %s3970_s14 }
   0x7   : > { %s90_s20 = ssub.s32 %s3974_s15, %s4029_s18  ;;  %p103_p0 = scmp.ne.s32.totalorder %s3970_s14, %s3966_s13 }
   0x8   : > { %p91_p1 = scmp.eq.s32.totalorder %s90_s20, 0  ;;  %p104_p2 = scmp.eq.s32.totalorder %s4025_s16, 1 }
   0x9   : > { %p109_p3 = scmp.ne.s32.totalorder %s3966_s13, %s3962_s12  ;;  %p110_p4 = scmp.eq.s32.totalorder %s2311_s17, 1 }
   0xa   : > { %s4040_s21 = scalar_select %p91_p1, %s3970_s14, %s93_s19  }
   0xb   : > { %p4042_p5 = por %p104_p2, %p103_p0  ;;  %p4046_p6 = por %p110_p4, %p109_p3 }
   0xc   : > { %p2312_p7 = scmp.ge.s32.totalorder %s3974_s15, 1  ;;  %p117_p8 = scmp.lt.s32.totalorder %s3974_s15, 3 }
   0xd   : > { %s4300_s22 = scalar_select %p4042_p5, 1, 0 }
   0xe   : > { %s4301_s23 = scalar_select %p4046_p6, 1, 0 }
   0xf   : > { %p4297_p9 = scmp.eq.s32.totalorder %s4025_s16, 0  ;;  %p4053_p10 = pnand %p2312_p7, %p117_p8 }
  0x10   : > { %s3976_s25 = smov [#allocation3]   ;;  %s3977_s28 = smov [#allocation6]  }
  0x11   : > { %s4302_s24 = scalar_select %p4053_p10, 1, 0 }
  0x12   : > { %s129_s26 = sshll.u32 %s3976_s25, 4  ;;  %p3791_p11 = pneg %p4053_p10  ;;  %s130_s26 = int_to_ptr.vmem [resolvable:$true] %s129_s26 }
  0x13   : > { %s142_s29 = sshll.u32 %s3977_s28, 4  ;;  %s3848_s5 = scalar_lea.hbm %s4294_s1, 61440  ;;  %s4065_s29 = int_to_ptr.vmem [resolvable:$true] %s142_s29 }
  0x14   : > { %p4061_p12 = pnand %p4297_p9, %p3791_p11  ;;  %p3849_p13 = scmp.ne.s32.totalorder %s4294_s1, %s3848_s5 }
  0x15   : > { %p3855_p3 = scmp.lt.u32.totalorder %s3848_s5, %s4294_s1 }
  0x16   : > { %p3850_p0 = pneg %p4061_p12 }
  0x18   : > { %p3851_p1 = pnand %p3850_p0, %p3849_p13 }
  0x1a   : > { %p3852_p2 = pneg %p3851_p1 }
  0x1c   : > { %p3857_p4 = pnand %p3855_p3, %p3852_p2 }
  0x1e   : > { %3860 = shalt.err (!%p3857_p4)
}
  0x1f   : > { %s3861_s10 = scalar_lea.vmem %s130_s26, 61440  ;;  %p3869_p9 = scmp.lt.s32.totalorder %s130_s26, %s130_s26 }
  0x20   : > { %p3862_p7 = scmp.ne.s32.totalorder %s130_s26, %s3861_s10  ;;  %p3870_p6 = scmp.lt.s32.totalorder %s3861_s10, %s3861_s10 }
  0x22   : > { %p3864_p8 = pnand %p3862_p7, %p3850_p0  ;;  %p3871_p5 = por %p3870_p6, %p3869_p9 }
  0x24   : > { %p3865_p11 = pneg %p3864_p8 }
  0x26   : > { %p3872_p10 = pnand %p3871_p5, %p3865_p11 }
  0x28   : > { %3875 = shalt.err (!%p3872_p10)
}
  0x29   : > { %s3978_s11 = smov 128   ;;  %s3979_s17 = smov 8  }
  0x2a   : > { %3794 = dma.hbm_to_vmem [thread:$0]  (!%p4061_p12), %s4294_s1, 61440, %s130_s26, [#allocation4], %s3978_s11, %s3978_s11, %s3979_s17  }
  0x2b   : > { %s3876_s30 = scalar_lea.hbm %s4295_s2, 256 }
  0x2c   : > { %p3877_p13 = scmp.ne.s32.totalorder %s4295_s2, %s3876_s30  ;;  %p3883_p9 = scmp.lt.u32.totalorder %s3876_s30, %s4295_s2 }
  0x2e   : > { %p3879_p5 = pnand %p3877_p13, %p3850_p0 }
  0x30   : > { %p3880_p6 = pneg %p3879_p5 }
  0x32   : > { %p3885_p10 = pnand %p3883_p9, %p3880_p6 }
  0x34   : > { %3888 = shalt.err (!%p3885_p10)
}
  0x35   : > { %s3889_s26 = scalar_lea.vmem %s4065_s29, 256  ;;  %p3897_p4 = scmp.lt.s32.totalorder %s4065_s29, %s4065_s29 }
  0x36   : > { %p3890_p1 = scmp.ne.s32.totalorder %s4065_s29, %s3889_s26  ;;  %p3898_p7 = scmp.lt.s32.totalorder %s3889_s26, %s3889_s26 }
  0x38   : > { %p3892_p2 = pnand %p3890_p1, %p3850_p0  ;;  %p3899_p8 = por %p3898_p7, %p3897_p4 }
  0x3a   : > { %p3893_p3 = pneg %p3892_p2 }
  0x3c   : > { %p3900_p11 = pnand %p3899_p8, %p3893_p3 }
  0x3e   : > { %3903 = shalt.err (!%p3900_p11)
}
  0x3f   : > { %3797 = dma.hbm_to_vmem [thread:$0]  (!%p4061_p12), %s4295_s2, 256, %s4065_s29, [#allocation7], %s3978_s11, %s3978_s11, %s3979_s17  }
  0x40   : > { %p4304_p13 = scmp.ne.s32.totalorder %s4302_s24, 0 }
  0x41   : > { %p4305_p5 = scmp.eq.s32.totalorder (!%p4304_p13), %s4025_s16, 0 }
  0x42   : > { %166 = sbr.rel (%p4304_p13) target bundleno = 2830 (0xb0e), region = 32 }
  0x49   : > { %3949 = dma.done.wait (%p4305_p5), [#allocation4], 61440   ;;  %p4306_p0 = pmov %p4305_p5 }
  0x4b   : > { %3951 = vsyncadd (%p4306_p0), [#allocation4], 4294905856  ;;  %p4307_p6 = pmov %p4306_p0 }
  0x4c   : > { %p4308_p9 = pmov %p4306_p0 }
  0x4d   : > { %3953 = dma.done.wait (%p4307_p6), [#allocation7], 256  }
  0x4e   : > { %3955 = vsyncadd (%p4308_p9), [#allocation7], 4294967040  ;;  %v3980_v0 = vmov 0.0   ;;  %v230_v1 = vld [vmem:[#allocation3 + $0x80] sm:$0xff]  ;;  %v231_v2 = vld [vmem:[#allocation3 + $0x88] sm:$0xff]  ;;  %p194_p12 = scmp.lt.s32.totalorder %s4025_s16, 1 }
  0x4f   : > { %201 = vst [vmem:[#allocation2 + $0x8] sm:$0xff] %v3980_v0  ;;  %199 = vst [vmem:[#allocation2] sm:$0xff] %v3980_v0  ;;  %v214_v3 = vld [vmem:[#allocation3] sm:$0xff]  ;;  %v3213_v4 = vpack.c.bf16 %v231_v2, %v230_v1  ;;  %v215_v5 = vld [vmem:[#allocation3 + $0x8] sm:$0xff]  ;;  %vm205_vm0 = vcmask 31744   ;;  %vm3982_vm1 = vmmov 0  }
  0x50   : > { %200 = vst [vmem:[#allocation2 + $0x18] sm:$0xff] %v3980_v0  ;;  %202 = vst [vmem:[#allocation2 + $0x10] sm:$0xff] %v3980_v0  ;;  %v232_v6 = vld [vmem:[#allocation3 + $0x90] sm:$0xff]  ;;  %v233_v7 = vld [vmem:[#allocation3 + $0x98] sm:$0xff]  ;;  %v3215_v8 = vpack.c.bf16 %v215_v5, %v214_v3  ;;  %s195_s24 = scalar_select %p194_p12, %s4025_s16, 1 }
  0x51   : > { %v3217_v9 = vpack.c.bf16 %v233_v7, %v232_v6  ;;  %v246_v10 = vld [vmem:[#allocation3 + $0x100] sm:$0xff]  ;;  %v247_v11 = vld [vmem:[#allocation3 + $0x108] sm:$0xff]  ;;  %v216_v12 = vld [vmem:[#allocation3 + $0x10] sm:$0xff]  ;;  %3214 = vmatprep.subr.bf16.mxu0 %v3213_v4  ;;  %s191_s17 = sand.u32 1, %s3966_s13   ;;  %s2335_s20 = sshll.u32 %s4025_s16, 6 }
  0x52   : > { %v3245_v13 = vpack.c.bf16 %v247_v11, %v246_v10  ;;  %v217_v14 = vld [vmem:[#allocation3 + $0x18] sm:$0xff]  ;;  %v234_v15 = vld [vmem:[#allocation3 + $0xa0] sm:$0xff]  ;;  %v235_v16 = vld [vmem:[#allocation3 + $0xa8] sm:$0xff]  ;;  %3216 = vmatpush3.bf16.msra.mxu0 %v3215_v8  ;;  %s2338_s27 = sshll.u32 %s195_s24, 4  ;;  %s2319_s19 = sshll.u32 %s191_s17, 2 }
  0x53   : > { %v3219_v17 = vpack.c.bf16 %v217_v14, %v216_v12  ;;  %v248_v18 = vld [vmem:[#allocation3 + $0x110] sm:$0xff]  ;;  %v249_v19 = vld [vmem:[#allocation3 + $0x118] sm:$0xff]  ;;  %3218 = vmatprep.subr.bf16.mxu0 %v3217_v9  ;;  %v3221_v20 = vpack.c.bf16 %v235_v16, %v234_v15  ;;  %v218_v22 = vld [vmem:[#allocation3 + $0x20] sm:$0xff]  ;;  %s198_s11 = scalar_lea.vmem %s4293_s0, %s2338_s27  ;;  %s193_s25 = scalar_lea.vmem [#allocation8], %s2319_s19 }
  0x54   : > { %3246 = vmatprep.subr.bf16.mxu1 %v3245_v13  ;;  %v3249_v21 = vpack.c.bf16 %v249_v19, %v248_v18  ;;  %v219_v23 = vld [vmem:[#allocation3 + $0x28] sm:$0xff]  ;;  %v236_v24 = vld [vmem:[#allocation3 + $0xb0] sm:$0xff]  ;;  %v237_v25 = vld [vmem:[#allocation3 + $0xb8] sm:$0xff]  ;;  %s2230_s28 = sshll.u32 %s193_s25, 4  ;;  %s4251_s5 = scalar_lea.hbm %s4296_s3, %s2335_s20  ;;  %s4253_s28 = int_to_ptr.vmem [resolvable:$true] %s2230_s28 }
  0x55   : > { %3248 = vmatpush3.bf16.msra.mxu1 %v3245_v13  ;;  %v250_v26 = vld [vmem:[#allocation3 + $0x120] sm:$0xff]  ;;  %v251_v27 = vld [vmem:[#allocation3 + $0x128] sm:$0xff]  ;;  %v3223_v29 = vpack.c.bf16 %v219_v23, %v218_v22  ;;  %v252_v30 = vld [vmem:[#allocation3 + $0x130] sm:$0xff]  ;;  %v3225_v32 = vpack.c.bf16 %v237_v25, %v236_v24  ;;  %s2217_s6 = scalar_lea.sflag [#allocation5], %s191_s17  ;;  %s3904_s7 = scalar_lea.vmem %s4253_s28, 64 }
  0x56   : > { %3250 = vmatprep.subr.bf16.mxu1 %v3249_v21  ;;  %v3253_v28 = vpack.c.bf16 %v251_v27, %v250_v26  ;;  %3220 = vmatpush3.bf16.msra.mxu0 %v3219_v17  ;;  %v253_v31 = vld [vmem:[#allocation3 + $0x138] sm:$0xff]  ;;  %v220_v33 = vld [vmem:[#allocation3 + $0x30] sm:$0xff]  ;;  %v238_v35 = vld [vmem:[#allocation3 + $0xc0] sm:$0xff]  ;;  %p3905_p10 = scmp.ne.s32.totalorder %s4253_s28, %s3904_s7  ;;  %p4309_p1 = scmp.ne.s32.totalorder %s4300_s22, 0 }
  0x57   : > { %3222 = vmatprep.subr.bf16.mxu0 %v3221_v20  ;;  %v221_v34 = vld [vmem:[#allocation3 + $0x38] sm:$0xff]  ;;  %v239_v36 = vld [vmem:[#allocation3 + $0xc8] sm:$0xff]  ;;  %v3257_v37 = vpack.c.bf16 %v253_v31, %v252_v30  ;;  %v254_v39 = vld [vmem:[#allocation3 + $0x140] sm:$0xff]  ;;  %s3983_s16 = smov [#allocation8]  }
  0x58   : > { %v3227_v38 = vpack.c.bf16 %v221_v34, %v220_v33  ;;  %v255_v40 = vld [vmem:[#allocation3 + $0x148] sm:$0xff]  ;;  %v3229_v41 = vpack.c.bf16 %v239_v36, %v238_v35  ;;  %v222_v42 = vld [vmem:[#allocation3 + $0x40] sm:$0xff]  ;;  %v240_v44 = vld [vmem:[#allocation3 + $0xd0] sm:$0xff]  ;;  %p3906_p2 = pnand %p3905_p10, %p4309_p1  ;;  %s3908_s26 = sshll.u32 %s3983_s16, 4  ;;  %s3909_s26 = int_to_ptr.vmem [resolvable:$false] %s3908_s26 }
  0x59   : > { %3252 = vmatpush3.bf16.msra.mxu1 %v3249_v21  ;;  %v223_v43 = vld [vmem:[#allocation3 + $0x48] sm:$0xff]  ;;  %v241_v45 = vld [vmem:[#allocation3 + $0xd8] sm:$0xff]  ;;  %v3261_v46 = vpack.c.bf16 %v255_v40, %v254_v39  ;;  %v203_v47 = vld [vmem:[%s198_s11] sm:$0xff]  ;;  %s3910_s8 = scalar_lea.vmem %s3909_s26, 128  ;;  %p3911_p4 = scmp.lt.s32.totalorder %s4253_s28, %s3909_s26 }
  0x5a   : > { %3254 = vmatprep.subr.bf16.mxu1 %v3253_v28  ;;  %3224 = vmatpush3.bf16.msra.mxu0 %v3223_v29  ;;  %v3231_v48 = vpack.c.bf16 %v223_v43, %v222_v42  ;;  %v256_v49 = vld [vmem:[#allocation3 + $0x150] sm:$0xff]  ;;  %v257_v50 = vld [vmem:[#allocation3 + $0x158] sm:$0xff]  ;;  %206 = vst.msk [vmem:[#allocation2 + $0x8] sm:$0xff] %vm205_vm0, %v203_v47  ;;  %v204_v51 = vld [vmem:[%s198_s11 + $0x8] sm:$0xff]  ;;  %v3233_v52 = vpack.c.bf16 %v241_v45, %v240_v44  ;;  %p3907_p3 = pneg %p3906_p2  ;;  %p3912_p7 = scmp.lt.s32.totalorder %s3910_s8, %s3904_s7 }
  0x5b   : > { %3226 = vmatprep.subr.bf16.mxu0 %v3225_v32  ;;  %v224_v53 = vld [vmem:[#allocation3 + $0x50] sm:$0xff]  ;;  %v225_v54 = vld [vmem:[#allocation3 + $0x58] sm:$0xff]  ;;  %207 = vst.msk [vmem:[#allocation2 + $0x10] sm:$0xff] %vm205_vm0, %v204_v51  ;;  %v242_v55 = vld [vmem:[#allocation3 + $0xe0] sm:$0xff]  ;;  %v3265_v57 = vpack.c.bf16 %v257_v50, %v256_v49 }
  0x5c   : > { %v243_v56 = vld [vmem:[#allocation3 + $0xe8] sm:$0xff]  ;;  %v3235_v58 = vpack.c.bf16 %v225_v54, %v224_v53  ;;  %v258_v59 = vld [vmem:[#allocation3 + $0x160] sm:$0xff]  ;;  %v244_v1 = vld [vmem:[#allocation3 + $0xf0] sm:$0xff]  ;;  %p3913_p8 = por %p3912_p7, %p3911_p4 }
  0x5d   : > { %3256 = vmatpush3.bf16.msra.mxu1 %v3253_v28  ;;  %v259_v60 = vld [vmem:[#allocation3 + $0x168] sm:$0xff]  ;;  %v3237_v61 = vpack.c.bf16 %v243_v56, %v242_v55  ;;  %v226_v62 = vld [vmem:[#allocation3 + $0x60] sm:$0xff]  ;;  %v245_v2 = vld [vmem:[#allocation3 + $0xf8] sm:$0xff] }
  0x5e   : > { %3258 = vmatprep.subr.bf16.mxu1 %v3257_v37  ;;  %3228 = vmatpush3.bf16.msra.mxu0 %v3227_v38  ;;  %v227_v63 = vld [vmem:[#allocation3 + $0x68] sm:$0xff]  ;;  %v3269_v3 = vpack.c.bf16 %v259_v60, %v258_v59  ;;  %v260_v6 = vld [vmem:[#allocation3 + $0x170] sm:$0xff]  ;;  %v261_v7 = vld [vmem:[#allocation3 + $0x178] sm:$0xff]  ;;  %v3241_v9 = vpack.c.bf16 %v245_v2, %v244_v1  ;;  %p3914_p11 = pnand %p3913_p8, %p3907_p3 }
  0x5f   : > { %3230 = vmatprep.subr.bf16.mxu0 %v3229_v41  ;;  %v3239_v5 = vpack.c.bf16 %v227_v63, %v226_v62  ;;  %v228_v10 = vld [vmem:[#allocation3 + $0x70] sm:$0xff]  ;;  %v229_v11 = vld [vmem:[#allocation3 + $0x78] sm:$0xff]  ;;  %v445_v12 = vld [vmem:[#allocation3 + $0x200] sm:$0xff]  ;;  %v3273_v14 = vpack.c.bf16 %v261_v7, %v260_v6 }
  0x60   : > { %v446_v13 = vld [vmem:[#allocation3 + $0x208] sm:$0xff]  ;;  %v3243_v15 = vpack.c.bf16 %v229_v11, %v228_v10  ;;  %v477_v16 = vld [vmem:[#allocation3 + $0x300] sm:$0xff]  ;;  %v447_v21 = vld [vmem:[#allocation3 + $0x210] sm:$0xff] }
  0x61   : > { %3260 = vmatpush3.bf16.msra.mxu1 %v3257_v37  ;;  %v210_v4 = vld [vmem:[#allocation2 + $0x8] sm:$0xff]  ;;  %v3277_v18 = vpack.c.bf16 %v446_v13, %v445_v12  ;;  %v429_v19 = vld [vmem:[#allocation3 + $0x180] sm:$0xff]  ;;  %v448_v22 = vld [vmem:[#allocation3 + $0x218] sm:$0xff] }
  0x62   : > { %3262 = vmatprep.subr.bf16.mxu1 %v3261_v46  ;;  %3232 = vmatpush3.bf16.msra.mxu0 %v3231_v48  ;;  %v212_v8 = vld [vmem:[#allocation2 + $0x9] sm:$0xff]  ;;  %v461_v24 = vld [vmem:[#allocation3 + $0x280] sm:$0xff]  ;;  %v480_v29 = vld [vmem:[#allocation3 + $0x318] sm:$0xff]  ;;  %v3281_v31 = vpack.c.bf16 %v448_v22, %v447_v21 }
  0x63   : > { %3234 = vmatprep.subr.bf16.mxu0 %v3233_v52  ;;  %331 = vmatprep.mubr.f32.mxu0 %v210_v4  ;;  %v478_v17 = vld [vmem:[#allocation3 + $0x308] sm:$0xff]  ;;  %v479_v28 = vld [vmem:[#allocation3 + $0x310] sm:$0xff]  ;;  %v432_v33 = vld [vmem:[#allocation3 + $0x198] sm:$0xff] }
  0x64   : > { %2895 = vmatprep.mubr.f32.mxu1 %v212_v8  ;;  %v430_v20 = vld [vmem:[#allocation3 + $0x188] sm:$0xff]  ;;  %v3309_v23 = vpack.c.bf16 %v478_v17, %v477_v16  ;;  %v211_v30 = vld [vmem:[#allocation2 + $0x10] sm:$0xff]  ;;  %v449_v36 = vld [vmem:[#allocation3 + $0x220] sm:$0xff]  ;;  %v3313_v38 = vpack.c.bf16 %v480_v29, %v479_v28 }
  0x65   : > { %3264 = vmatpush3.bf16.msra.mxu1 %v3261_v46  ;;  %v462_v25 = vld [vmem:[#allocation3 + $0x288] sm:$0xff]  ;;  %v3279_v27 = vpack.c.bf16 %v430_v20, %v429_v19  ;;  %v431_v32 = vld [vmem:[#allocation3 + $0x190] sm:$0xff]  ;;  %v464_v40 = vld [vmem:[#allocation3 + $0x298] sm:$0xff] }
  0x66   : > { %3266 = vmatprep.subr.bf16.mxu1 %v3265_v57  ;;  %3236 = vmatpush3.bf16.msra.mxu0 %v3235_v58  ;;  %v208_v26 = vld [vmem:[#allocation2 + $0x7] sm:$0xff]  ;;  %v213_v34 = vld [vmem:[#allocation2 + $0x11] sm:$0xff]  ;;  %v3311_v35 = vpack.c.bf16 %v462_v25, %v461_v24  ;;  %v3283_v42 = vpack.c.bf16 %v432_v33, %v431_v32 }
  0x67   : > { %3238 = vmatprep.subr.bf16.mxu0 %v3237_v61  ;;  %v450_v37 = vld [vmem:[#allocation3 + $0x228] sm:$0xff]  ;;  %v463_v39 = vld [vmem:[#allocation3 + $0x290] sm:$0xff]  ;;  %v481_v43 = vld [vmem:[#allocation3 + $0x320] sm:$0xff] }
  0x68   : > { %v209_v41 = vld [vmem:[#allocation2 + $0xf] sm:$0xff]  ;;  %v3285_v45 = vpack.c.bf16 %v450_v37, %v449_v36  ;;  %v3315_v46 = vpack.c.bf16 %v464_v40, %v463_v39  ;;  %v433_v48 = vld [vmem:[#allocation3 + $0x1a0] sm:$0xff]  ;;  %v452_v55 = vld [vmem:[#allocation3 + $0x238] sm:$0xff] }
  0x69   : > { %3268 = vmatpush3.bf16.msra.mxu1 %v3265_v57  ;;  %v482_v44 = vld [vmem:[#allocation3 + $0x328] sm:$0xff]  ;;  %v465_v50 = vld [vmem:[#allocation3 + $0x2a0] sm:$0xff]  ;;  %v451_v54 = vld [vmem:[#allocation3 + $0x230] sm:$0xff] }
  0x6a   : > { %3270 = vmatprep.subr.bf16.mxu1 %v3269_v3  ;;  %3240 = vmatpush3.bf16.msra.mxu0 %v3239_v5  ;;  %v3317_v47 = vpack.c.bf16 %v482_v44, %v481_v43  ;;  %v434_v49 = vld [vmem:[#allocation3 + $0x1a8] sm:$0xff]  ;;  %v483_v56 = vld [vmem:[#allocation3 + $0x330] sm:$0xff]  ;;  %v3289_v57 = vpack.c.bf16 %v452_v55, %v451_v54  ;;  %v484_v58 = vld [vmem:[#allocation3 + $0x338] sm:$0xff] }
  0x6b   : > { %3242 = vmatprep.subr.bf16.mxu0 %v3241_v9  ;;  %v3287_v51 = vpack.c.bf16 %v434_v49, %v433_v48  ;;  %v466_v52 = vld [vmem:[#allocation3 + $0x2a8] sm:$0xff]  ;;  %v435_v59 = vld [vmem:[#allocation3 + $0x1b0] sm:$0xff]  ;;  %v436_v60 = vld [vmem:[#allocation3 + $0x1b8] sm:$0xff]  ;;  %v3321_v61 = vpack.c.bf16 %v484_v58, %v483_v56 }
  0x6c   : > { %v3319_v53 = vpack.c.bf16 %v466_v52, %v465_v50  ;;  %v3291_v62 = vpack.c.bf16 %v436_v60, %v435_v59  ;;  %v467_v63 = vld [vmem:[#allocation3 + $0x2b0] sm:$0xff]  ;;  %v468_v1 = vld [vmem:[#allocation3 + $0x2b8] sm:$0xff]  ;;  %v454_v4 = vld [vmem:[#allocation3 + $0x248] sm:$0xff] }
  0x6d   : > { %3272 = vmatpush3.bf16.msra.mxu1 %v3269_v3  ;;  %v3323_v2 = vpack.c.bf16 %v468_v1, %v467_v63  ;;  %v453_v3 = vld [vmem:[#allocation3 + $0x240] sm:$0xff]  ;;  %v486_v7 = vld [vmem:[#allocation3 + $0x348] sm:$0xff]  ;;  %v456_v16 = vld [vmem:[#allocation3 + $0x258] sm:$0xff] }
  0x6e   : > { %3274 = vmatprep.subr.bf16.mxu1 %v3273_v14  ;;  %3244 = vmatpush3.bf16.msra.mxu0 %v3243_v15  ;;  %v485_v5 = vld [vmem:[#allocation3 + $0x340] sm:$0xff]  ;;  %v3293_v6 = vpack.c.bf16 %v454_v4, %v453_v3  ;;  %v438_v9 = vld [vmem:[#allocation3 + $0x1c8] sm:$0xff]  ;;  %v455_v15 = vld [vmem:[#allocation3 + $0x250] sm:$0xff] }
  0x6f   : > { %3278 = vmatprep.subr.bf16.mxu0 %v3277_v18  ;;  %v437_v8 = vld [vmem:[#allocation3 + $0x1c0] sm:$0xff]  ;;  %v3325_v10 = vpack.c.bf16 %v486_v7, %v485_v5  ;;  %v470_v13 = vld [vmem:[#allocation3 + $0x2c8] sm:$0xff]  ;;  %v487_v17 = vld [vmem:[#allocation3 + $0x350] sm:$0xff]  ;;  %v3297_v18 = vpack.c.bf16 %v456_v16, %v455_v15 }
  0x70   : > { %v3295_v11 = vpack.c.bf16 %v438_v9, %v437_v8  ;;  %v469_v12 = vld [vmem:[#allocation3 + $0x2c0] sm:$0xff]  ;;  %v488_v19 = vld [vmem:[#allocation3 + $0x358] sm:$0xff]  ;;  %v439_v20 = vld [vmem:[#allocation3 + $0x1d0] sm:$0xff] }
  0x71   : > { %3276 = vmatpush3.bf16.msra.mxu1 %v3273_v14  ;;  %332 = vmatmul.mubr.f32.vlgmr.msra.gmra.mrb[0].mxu0 %v208_v26  ;;  %v3327_v14 = vpack.c.bf16 %v470_v13, %v469_v12  ;;  %v440_v21 = vld [vmem:[#allocation3 + $0x1d8] sm:$0xff]  ;;  %v3329_v22 = vpack.c.bf16 %v488_v19, %v487_v17  ;;  %v471_v24 = vld [vmem:[#allocation3 + $0x2d0] sm:$0xff]  ;;  %v458_v28 = vld [vmem:[#allocation3 + $0x268] sm:$0xff] }
  0x72   : > { %3310 = vmatprep.subr.bf16.mxu1 %v3309_v23  ;;  %336 = vmatprep.mubr.f32.mxu0 %v211_v30  ;;  %v3299_v23 = vpack.c.bf16 %v440_v21, %v439_v20  ;;  %v472_v25 = vld [vmem:[#allocation3 + $0x2d8] sm:$0xff]  ;;  %v489_v29 = vld [vmem:[#allocation3 + $0x360] sm:$0xff]  ;;  %v442_v33 = vld [vmem:[#allocation3 + $0x1e8] sm:$0xff] }
  0x73   : > { %3280 = vmatpush3.bf16.msra.mxu0 %v3279_v27  ;;  %v3331_v26 = vpack.c.bf16 %v472_v25, %v471_v24  ;;  %v457_v27 = vld [vmem:[#allocation3 + $0x260] sm:$0xff]  ;;  %v474_v37 = vld [vmem:[#allocation3 + $0x2e8] sm:$0xff]  ;;  %v460_v40 = vld [vmem:[#allocation3 + $0x278] sm:$0xff] }
  0x74   : > { %2896 = vmatmul.mubr.f32.vlgmr.msra.gmra.mrb[0].mxu1 %v213_v34  ;;  %3282 = vmatprep.subr.bf16.mxu0 %v3281_v31  ;;  %v3301_v30 = vpack.c.bf16 %v458_v28, %v457_v27  ;;  %v490_v31 = vld [vmem:[#allocation3 + $0x368] sm:$0xff]  ;;  %v441_v32 = vld [vmem:[#allocation3 + $0x1e0] sm:$0xff]  ;;  %v476_v49 = vld [vmem:[#allocation3 + $0x2f8] sm:$0xff] }
  0x75   : > { %3312 = vmatpush3.bf16.msra.mxu1 %v3311_v35  ;;  %337 = vmatmul.mubr.f32.gmra.mrb[2].mxu0 %v209_v41  ;;  %v3333_v34 = vpack.c.bf16 %v490_v31, %v489_v29  ;;  %v3303_v35 = vpack.c.bf16 %v442_v33, %v441_v32  ;;  %v473_v36 = vld [vmem:[#allocation3 + $0x2e0] sm:$0xff]  ;;  %v491_v41 = vld [vmem:[#allocation3 + $0x370] sm:$0xff]  ;;  %v661_v52 = vld [vmem:[#allocation3 + $0x408] sm:$0xff] }
  0x76   : > { %3314 = vmatprep.subr.bf16.mxu1 %v3313_v38  ;;  %v459_v38 = vld [vmem:[#allocation3 + $0x270] sm:$0xff]  ;;  %v3335_v39 = vpack.c.bf16 %v474_v37, %v473_v36  ;;  %v676_v7 = vld [vmem:[#allocation3 + $0x480] sm:$0xff]  ;;  %v677_v8 = vld [vmem:[#allocation3 + $0x488] sm:$0xff] }
  0x77   : > { %3284 = vmatpush3.bf16.msra.mxu0 %v3283_v42  ;;  %v492_v42 = vld [vmem:[#allocation3 + $0x378] sm:$0xff]  ;;  %v3305_v43 = vpack.c.bf16 %v460_v40, %v459_v38  ;;  %v644_v9 = vld [vmem:[#allocation3 + $0x380] sm:$0xff]  ;;  %v678_v13 = vld [vmem:[#allocation3 + $0x490] sm:$0xff] }
  0x78   : > { %3286 = vmatprep.subr.bf16.mxu0 %v3285_v45  ;;  %v3337_v44 = vpack.c.bf16 %v492_v42, %v491_v41  ;;  %v443_v45 = vld [vmem:[#allocation3 + $0x1f0] sm:$0xff]  ;;  %v663_v12 = vld [vmem:[#allocation3 + $0x418] sm:$0xff]  ;;  %v664_v24 = vld [vmem:[#allocation3 + $0x420] sm:$0xff] }
  0x79   : > { %3316 = vmatpush3.bf16.msra.mxu1 %v3315_v46  ;;  %v444_v46 = vld [vmem:[#allocation3 + $0x1f8] sm:$0xff]  ;;  %v646_v17 = vld [vmem:[#allocation3 + $0x390] sm:$0xff]  ;;  %v665_v25 = vld [vmem:[#allocation3 + $0x428] sm:$0xff] }
  0x7a   : > { %3318 = vmatprep.subr.bf16.mxu1 %v3317_v47  ;;  %v475_v47 = vld [vmem:[#allocation3 + $0x2f0] sm:$0xff]  ;;  %v3307_v48 = vpack.c.bf16 %v444_v46, %v443_v45  ;;  %v679_v16 = vld [vmem:[#allocation3 + $0x498] sm:$0xff]  ;;  %v680_v28 = vld [vmem:[#allocation3 + $0x4a0] sm:$0xff]  ;;  %v3349_v29 = vpack.c.bf16 %v665_v25, %v664_v24 }
  0x7b   : > { %3288 = vmatpush3.bf16.msra.mxu0 %v3287_v51  ;;  %v3339_v50 = vpack.c.bf16 %v476_v49, %v475_v47  ;;  %v660_v51 = vld [vmem:[#allocation3 + $0x400] sm:$0xff]  ;;  %v649_v32 = vld [vmem:[#allocation3 + $0x3a8] sm:$0xff]  ;;  %v666_v33 = vld [vmem:[#allocation3 + $0x430] sm:$0xff] }
  0x7c   : > { %3290 = vmatprep.subr.bf16.mxu0 %v3289_v57  ;;  %v3341_v54 = vpack.c.bf16 %v661_v52, %v660_v51  ;;  %v2322_v57 = vld [vmem:[#allocation6] ss:$0 sm:$0xff]  ;;  %v682_v38 = vld [vmem:[#allocation3 + $0x4b0] sm:$0xff]  ;;  %v651_v42 = vld [vmem:[#allocation3 + $0x3b8] sm:$0xff] }
  0x7d   : > { %3320 = vmatpush3.bf16.msra.mxu1 %v3319_v53  ;;  %v3981_v53 = vmov 0.0|0.0   ;;  %v648_v31 = vld [vmem:[#allocation3 + $0x3a0] sm:$0xff]  ;;  %v650_v41 = vld [vmem:[#allocation3 + $0x3b0] sm:$0xff]  ;;  %v669_v45 = vld [vmem:[#allocation3 + $0x448] sm:$0xff] }
  0x7e   : > { %3322 = vmatprep.subr.bf16.mxu1 %v3321_v61  ;;  %v3351_v36 = vpack.c.bf16 %v649_v32, %v648_v31  ;;  %v684_v47 = vld [vmem:[#allocation3 + $0x4c0] sm:$0xff]  ;;  %v653_v51 = vld [vmem:[#allocation3 + $0x3c8] sm:$0xff]  ;;  %v840_v31 = vld [vmem:[#allocation3 + $0x510] sm:$0xff] }
  0x7f   : > { %3292 = vmatpush3.bf16.msra.mxu0 %v3291_v62  ;;  %v652_v49 = vld [vmem:[#allocation3 + $0x3c0] sm:$0xff]  ;;  %v841_v32 = vld [vmem:[#allocation3 + $0x518] sm:$0xff] }
  0x80   : > { %3294 = vmatprep.subr.bf16.mxu0 %v3293_v6  ;;  %v3359_v52 = vpack.c.bf16 %v653_v51, %v652_v49  ;;  %v851_v49 = vld [vmem:[#allocation3 + $0x568] sm:$0xff]  ;;  %v852_v51 = vld [vmem:[#allocation3 + $0x570] sm:$0xff] }
  0x81   : > { %3324 = vmatpush3.bf16.msra.mxu1 %v3323_v2 }
  0x82   : > { %3326 = vmatprep.subr.bf16.mxu1 %v3325_v10  ;;  %v645_v10 = vld [vmem:[#allocation3 + $0x388] sm:$0xff] }
  0x83   : > { %3296 = vmatpush3.bf16.msra.mxu0 %v3295_v11  ;;  %v662_v11 = vld [vmem:[#allocation3 + $0x410] sm:$0xff]  ;;  %v3343_v15 = vpack.c.bf16 %v645_v10, %v644_v9  ;;  %v675_v9 = vld [vmem:[#allocation3 + $0x478] sm:$0xff] }
  0x84   : > { %3298 = vmatprep.subr.bf16.mxu0 %v3297_v18  ;;  %v647_v18 = vld [vmem:[#allocation3 + $0x398] sm:$0xff] }
  0x85   : > { %3328 = vmatpush3.bf16.msra.mxu1 %v3327_v14  ;;  %v3374_v14 = vpack.c.bf16 %v677_v8, %v676_v7  ;;  %v3347_v27 = vpack.c.bf16 %v647_v18, %v646_v17  ;;  %v657_v7 = vld [vmem:[#allocation3 + $0x3e8] sm:$0xff]  ;;  %v674_v8 = vld [vmem:[#allocation3 + $0x470] sm:$0xff] }
  0x86   : > { %3330 = vmatprep.subr.bf16.mxu1 %v3329_v22  ;;  %v3345_v22 = vpack.c.bf16 %v663_v12, %v662_v11  ;;  %v3369_v11 = vpack.c.bf16 %v675_v9, %v674_v8  ;;  %v690_v12 = vld [vmem:[#allocation3 + $0x4f0] sm:$0xff]  ;;  %v940_v8 = vld [vmem:[#allocation3 + $0x5a8] sm:$0xff] }
  0x87   : > { %3300 = vmatpush3.bf16.msra.mxu0 %v3299_v23 }
  0x88   : > { %3302 = vmatprep.subr.bf16.mxu0 %v3301_v30  ;;  %v681_v30 = vld [vmem:[#allocation3 + $0x4a8] sm:$0xff] }
  0x89   : > { %3332 = vmatpush3.bf16.msra.mxu1 %v3331_v26  ;;  %v3377_v26 = vpack.c.bf16 %v679_v16, %v678_v13  ;;  %v691_v13 = vld [vmem:[#allocation3 + $0x4f8] sm:$0xff] }
  0x8a   : > { %3334 = vmatprep.subr.bf16.mxu1 %v3333_v34  ;;  %v667_v34 = vld [vmem:[#allocation3 + $0x438] sm:$0xff] }
  0x8b   : > { %3304 = vmatpush3.bf16.msra.mxu0 %v3303_v35  ;;  %v3380_v35 = vpack.c.bf16 %v681_v30, %v680_v28  ;;  %v3353_v37 = vpack.c.bf16 %v667_v34, %v666_v33  ;;  %v659_v16 = vld [vmem:[#allocation3 + $0x3f8] sm:$0xff]  ;;  %v838_v28 = vld [vmem:[#allocation3 + $0x500] sm:$0xff] }
  0x8c   : > { %3306 = vmatprep.subr.bf16.mxu0 %v3305_v43  ;;  %v3355_v43 = vpack.c.bf16 %v651_v42, %v650_v41  ;;  %v846_v42 = vld [vmem:[#allocation3 + $0x540] sm:$0xff] }
  0x8d   : > { %3336 = vmatpush3.bf16.msra.mxu1 %v3335_v39  ;;  %v683_v39 = vld [vmem:[#allocation3 + $0x4b8] sm:$0xff] }
  0x8e   : > { %3338 = vmatprep.subr.bf16.mxu1 %v3337_v44  ;;  %v3383_v40 = vpack.c.bf16 %v683_v39, %v682_v38  ;;  %v668_v44 = vld [vmem:[#allocation3 + $0x440] sm:$0xff]  ;;  %v844_v39 = vld [vmem:[#allocation3 + $0x530] sm:$0xff] }
  0x8f   : > { %3308 = vmatpush3.bf16.msra.mxu0 %v3307_v48  ;;  %v3357_v46 = vpack.c.bf16 %v669_v45, %v668_v44  ;;  %v685_v48 = vld [vmem:[#allocation3 + $0x4c8] sm:$0xff]  ;;  %v848_v45 = vld [vmem:[#allocation3 + $0x550] sm:$0xff] }
  0x90   : > { %3342 = vmatprep.subr.bf16.mxu0 %v3341_v54  ;;  %v670_v54 = vld [vmem:[#allocation3 + $0x450] sm:$0xff] }
  0x91   : > { %3340 = vmatpush3.bf16.msra.mxu1 %v3339_v50  ;;  %v3386_v50 = vpack.c.bf16 %v685_v48, %v684_v47  ;;  %v850_v48 = vld [vmem:[#allocation3 + $0x560] sm:$0xff] }
  0x92   : > { %3373 = vmatprep.subr.bf16.mxu1 %v3981_v53 }
 0x144   : > { %v2371_v55 = vpop.f32.mrb[0].mxu0 }
 0x145   : > { %v2372_v56 = vpop.f32.mrb[1].mxu0 }
 0x146   : > { %v2373_v58 = vadd.f32 %v2372_v56, %v2371_v55  ;;  %v671_v55 = vld [vmem:[#allocation3 + $0x458] sm:$0xff] }
 0x147   : > { %v2897_v59 = vpop.f32.mrb[0].mxu1  ;;  %v3361_v56 = vpack.c.bf16 %v671_v55, %v670_v54  ;;  %v951_v55 = vld [vmem:[#allocation3 + $0x600] sm:$0xff] }
 0x148   : > { %v408_v60 = vpop.f32.mrb[1].mxu1  ;;  %v2374_v61 = vpop.f32.mrb[2].mxu0  ;;  %v334_v62 = vadd.f32 %v2373_v58, %v2322_v57  ;;  %v687_v58 = vld [vmem:[#allocation3 + $0x4d8] sm:$0xff] }
 0x149   : > { %v2375_v63 = vpop.f32.mrb[3].mxu0 }
 0x14a   : > { %v2376_v1 = vadd.f32 %v2375_v63, %v2374_v61  ;;  %v409_v2 = vadd.f32 %v408_v60, %v334_v62  ;;  %v655_v61 = vld [vmem:[#allocation3 + $0x3d8] sm:$0xff]  ;;  %v672_v63 = vld [vmem:[#allocation3 + $0x460] sm:$0xff] }
 0x14c   : > { %v339_v3 = vadd.f32 %v2376_v1, %v2322_v57  ;;  %v417_v4 = vmax.f32 %v409_v2, 0.0  ;;  %v686_v57 = vld [vmem:[#allocation3 + $0x4d0] sm:$0xff]  ;;  %v673_v1 = vld [vmem:[#allocation3 + $0x468] sm:$0xff] }
 0x14d   : > { %v3389_v60 = vpack.c.bf16 %v687_v58, %v686_v57  ;;  %v3365_v2 = vpack.c.bf16 %v673_v1, %v672_v63  ;;  %v935_v58 = vld [vmem:[#allocation3 + $0x580] sm:$0xff]  ;;  %v937_v1 = vld [vmem:[#allocation3 + $0x590] sm:$0xff] }
 0x14e   : > { %v414_v5 = vadd.f32 %v2897_v59, %v339_v3  ;;  %419 = vst [vmem:[#allocation2 + $0x8] sm:$0xff] %v417_v4  ;;  %v654_v59 = vld [vmem:[#allocation3 + $0x3d0] sm:$0xff]  ;;  %v688_v3 = vld [vmem:[#allocation3 + $0x4e0] sm:$0xff]  ;;  %v689_v4 = vld [vmem:[#allocation3 + $0x4e8] sm:$0xff] }
 0x14f   : > { %v3363_v62 = vpack.c.bf16 %v655_v61, %v654_v59  ;;  %v936_v59 = vld [vmem:[#allocation3 + $0x588] sm:$0xff]  ;;  %v953_v61 = vld [vmem:[#allocation3 + $0x610] sm:$0xff] }
 0x150   : > { %v418_v6 = vmax.f32 %v414_v5, 0.0  ;;  %v656_v5 = vld [vmem:[#allocation3 + $0x3e0] sm:$0xff] }
 0x151   : > { %v3367_v10 = vpack.c.bf16 %v657_v7, %v656_v5  ;;  %v956_v5 = vld [vmem:[#allocation3 + $0x628] sm:$0xff]  ;;  %v939_v7 = vld [vmem:[#allocation3 + $0x5a0] sm:$0xff] }
 0x152   : > { %420 = vst [vmem:[#allocation2 + $0x10] sm:$0xff] %v418_v6  ;;  %v3392_v6 = vpack.c.bf16 %v689_v4, %v688_v3  ;;  %v955_v4 = vld [vmem:[#allocation3 + $0x620] sm:$0xff]  ;;  %v3431_v9 = vpack.c.bf16 %v940_v8, %v939_v7  ;;  %v949_v7 = vld [vmem:[#allocation3 + $0x5f0] sm:$0xff] }
 0x159   : > { %v424_v19 = vld [vmem:[#allocation2 + $0x8] ss:$2 sm:$0xff]  ;;  %v422_v21 = vld [vmem:[#allocation2 + $0x7] ss:$2 sm:$0xff] }
 0x15a   : > { %v428_v20 = vld [vmem:[#allocation2 + $0xa] ss:$2 sm:$0xff]  ;;  %562 = vmatprep.mubr.f32.mxu0 %v424_v19  ;;  %v426_v23 = vld [vmem:[#allocation2 + $0x9] ss:$2 sm:$0xff] }
 0x15b   : > { %632 = vmatprep.mubr.f32.mxu1 %v428_v20  ;;  %563 = vmatmul.mubr.f32.vlgmr.msra.gmra.mrb[4].mxu0 %v422_v21  ;;  %639 = vst [vmem:[#allocation2 + $0x10] sm:$0xff] %v3980_v0  ;;  %v2323_v20 = vld [vmem:[#allocation6 + $0x1] ss:$0 sm:$0xff] }
 0x15c   : > { %633 = vmatmul.mubr.f32.vlgmr.msra.gmra.mrb[2].mxu1 %v426_v23  ;;  %3344 = vmatpush3.bf16.msra.mxu0 %v3343_v15  ;;  %v3395_v15 = vpack.c.bf16 %v691_v13, %v690_v12  ;;  %v941_v13 = vld [vmem:[#allocation3 + $0x5b0] sm:$0xff] }
 0x15d   : > { %3375 = vmatpush3.bf16.msra.mxu1 %v3374_v14  ;;  %3346 = vmatprep.subr.bf16.mxu0 %v3345_v22  ;;  %v658_v14 = vld [vmem:[#allocation3 + $0x3f0] sm:$0xff] }
 0x15e   : > { %3376 = vmatprep.subr.bf16.mxu1 %v3981_v53  ;;  %2930 = vmatprep.mubr.msk.f32.mxu1 %vm3982_vm1, %v3980_v0  ;;  %v3371_v17 = vpack.c.bf16 %v659_v16, %v658_v14  ;;  %v942_v14 = vld [vmem:[#allocation3 + $0x5b8] sm:$0xff] }
 0x160   : > { %3348 = vmatpush3.bf16.msra.mxu0 %v3347_v27 }
 0x161   : > { %3378 = vmatpush3.bf16.msra.mxu1 %v3377_v26  ;;  %3350 = vmatprep.subr.bf16.mxu0 %v3349_v29  ;;  %v839_v29 = vld [vmem:[#allocation3 + $0x508] sm:$0xff] }
 0x162   : > { %3379 = vmatprep.subr.bf16.mxu1 %v3981_v53  ;;  %v3398_v30 = vpack.c.bf16 %v839_v29, %v838_v28  ;;  %v969_v29 = vld [vmem:[#allocation3 + $0x690] sm:$0xff] }
 0x164   : > { %3352 = vmatpush3.bf16.msra.mxu0 %v3351_v36  ;;  %v842_v36 = vld [vmem:[#allocation3 + $0x520] sm:$0xff] }
 0x165   : > { %3381 = vmatpush3.bf16.msra.mxu1 %v3380_v35  ;;  %3354 = vmatprep.subr.bf16.mxu0 %v3353_v37  ;;  %v3401_v35 = vpack.c.bf16 %v841_v32, %v840_v31  ;;  %v843_v37 = vld [vmem:[#allocation3 + $0x528] sm:$0xff]  ;;  %v971_v32 = vld [vmem:[#allocation3 + $0x6a0] sm:$0xff] }
 0x166   : > { %3382 = vmatprep.subr.bf16.mxu1 %v3981_v53  ;;  %v3404_v38 = vpack.c.bf16 %v843_v37, %v842_v36  ;;  %v974_v36 = vld [vmem:[#allocation3 + $0x6b8] sm:$0xff] }
 0x168   : > { %3356 = vmatpush3.bf16.msra.mxu0 %v3355_v43  ;;  %v847_v43 = vld [vmem:[#allocation3 + $0x548] sm:$0xff] }
 0x169   : > { %3384 = vmatpush3.bf16.msra.mxu1 %v3383_v40  ;;  %3358 = vmatprep.subr.bf16.mxu0 %v3357_v46  ;;  %v845_v40 = vld [vmem:[#allocation3 + $0x538] sm:$0xff]  ;;  %v3410_v44 = vpack.c.bf16 %v847_v43, %v846_v42  ;;  %v943_v42 = vld [vmem:[#allocation3 + $0x5c0] sm:$0xff] }
 0x16a   : > { %3385 = vmatprep.subr.bf16.mxu1 %v3981_v53  ;;  %v3407_v41 = vpack.c.bf16 %v845_v40, %v844_v39  ;;  %v849_v46 = vld [vmem:[#allocation3 + $0x558] sm:$0xff]  ;;  %v960_v39 = vld [vmem:[#allocation3 + $0x648] sm:$0xff]  ;;  %v975_v40 = vld [vmem:[#allocation3 + $0x6c0] sm:$0xff] }
 0x16b   : > { %v3413_v47 = vpack.c.bf16 %v849_v46, %v848_v45  ;;  %v961_v46 = vld [vmem:[#allocation3 + $0x650] sm:$0xff] }
 0x16c   : > { %3360 = vmatpush3.bf16.msra.mxu0 %v3359_v52  ;;  %v853_v52 = vld [vmem:[#allocation3 + $0x578] sm:$0xff] }
 0x16d   : > { %3387 = vmatpush3.bf16.msra.mxu1 %v3386_v50  ;;  %3362 = vmatprep.subr.bf16.mxu0 %v3361_v56  ;;  %v3416_v50 = vpack.c.bf16 %v851_v49, %v850_v48  ;;  %v3419_v54 = vpack.c.bf16 %v853_v52, %v852_v51  ;;  %v952_v56 = vld [vmem:[#allocation3 + $0x608] sm:$0xff]  ;;  %v977_v49 = vld [vmem:[#allocation3 + $0x6d0] sm:$0xff] }
 0x16e   : > { %3388 = vmatprep.subr.bf16.mxu1 %v3981_v53  ;;  %v3421_v57 = vpack.c.bf16 %v952_v56, %v951_v55  ;;  %v945_v51 = vld [vmem:[#allocation3 + $0x5d0] sm:$0xff]  ;;  %v963_v56 = vld [vmem:[#allocation3 + $0x660] sm:$0xff] }
 0x170   : > { %3364 = vmatpush3.bf16.msra.mxu0 %v3363_v62  ;;  %v954_v62 = vld [vmem:[#allocation3 + $0x618] sm:$0xff] }
 0x171   : > { %3390 = vmatpush3.bf16.msra.mxu1 %v3389_v60  ;;  %3366 = vmatprep.subr.bf16.mxu0 %v3365_v2  ;;  %v3423_v60 = vpack.c.bf16 %v936_v59, %v935_v58  ;;  %v3425_v63 = vpack.c.bf16 %v954_v62, %v953_v61  ;;  %v938_v2 = vld [vmem:[#allocation3 + $0x598] sm:$0xff]  ;;  %v979_v59 = vld [vmem:[#allocation3 + $0x6e0] sm:$0xff] }
 0x172   : > { %3391 = vmatprep.subr.bf16.mxu1 %v3981_v53  ;;  %v3427_v3 = vpack.c.bf16 %v938_v2, %v937_v1  ;;  %v947_v61 = vld [vmem:[#allocation3 + $0x5e0] sm:$0xff]  ;;  %v965_v1 = vld [vmem:[#allocation3 + $0x670] sm:$0xff]  ;;  %v966_v2 = vld [vmem:[#allocation3 + $0x678] sm:$0xff] }
 0x174   : > { %3368 = vmatpush3.bf16.msra.mxu0 %v3367_v10  ;;  %v957_v10 = vld [vmem:[#allocation3 + $0x630] sm:$0xff] }
 0x175   : > { %3393 = vmatpush3.bf16.msra.mxu1 %v3392_v6  ;;  %3370 = vmatprep.subr.bf16.mxu0 %v3369_v11  ;;  %v3429_v6 = vpack.c.bf16 %v956_v5, %v955_v4  ;;  %v958_v11 = vld [vmem:[#allocation3 + $0x638] sm:$0xff]  ;;  %v3449_v4 = vpack.c.bf16 %v966_v2, %v965_v1  ;;  %v981_v5 = vld [vmem:[#allocation3 + $0x6f0] sm:$0xff] }
 0x176   : > { %3394 = vmatprep.subr.bf16.mxu1 %v3981_v53  ;;  %v3433_v12 = vpack.c.bf16 %v958_v11, %v957_v10  ;;  %v2325_v11 = vld [vmem:[#allocation6 + $0x3] ss:$0 sm:$0xff]  ;;  %v1248_v2 = vld [vmem:[#allocation3 + $0x830] sm:$0xff] }
 0x178   : > { %3372 = vmatpush3.bf16.msra.mxu0 %v3371_v17 }
 0x179   : > { %3396 = vmatpush3.bf16.msra.mxu1 %v3395_v15  ;;  %3397 = vmatprep.subr.bf16.mxu0 %v3981_v53  ;;  %v3435_v15 = vpack.c.bf16 %v942_v14, %v941_v13 }
 0x17a   : > { %3422 = vmatprep.subr.bf16.mxu1 %v3421_v57  ;;  %v964_v57 = vld [vmem:[#allocation3 + $0x668] sm:$0xff] }
 0x17b   : > { %v3445_v58 = vpack.c.bf16 %v964_v57, %v963_v56  ;;  %v1228_v56 = vld [vmem:[#allocation3 + $0x790] sm:$0xff]  ;;  %v1229_v57 = vld [vmem:[#allocation3 + $0x798] sm:$0xff] }
 0x22e   : > { %v2427_v18 = vpop.f32.mrb[4].mxu0 }
 0x22f   : > { %v2462_v19 = vpop.f32.mrb[2].mxu1  ;;  %v2428_v21 = vpop.f32.mrb[5].mxu0 }
 0x230   : > { %v2463_v22 = vpop.f32.mrb[3].mxu1  ;;  %v2429_v23 = vadd.f32 %v2428_v21, %v2427_v18 }
 0x231   : > { %v2464_v24 = vadd.f32 %v2463_v22, %v2462_v19  ;;  %v2324_v19 = vld [vmem:[#allocation6 + $0x2] ss:$0 sm:$0xff] }
 0x232   : > { %v565_v25 = vadd.f32 %v2429_v23, %v2323_v20  ;;  %v967_v23 = vld [vmem:[#allocation3 + $0x680] sm:$0xff] }
 0x234   : > { %v4149_v26 = vadd.f32 %v2464_v24, %v565_v25  ;;  %v968_v24 = vld [vmem:[#allocation3 + $0x688] sm:$0xff] }
 0x236   : > { %v638_v27 = vmax.f32 %v4149_v26, 0.0 }
 0x238   : > { %640 = vst [vmem:[#allocation2 + $0x8] sm:$0xff] %v638_v27  ;;  %761 = vmatprep.mubr.f32.mxu0 %v638_v27  ;;  %v3454_v27 = vpack.c.bf16 %v968_v24, %v967_v23 }
 0x23f   : > { %v643_v33 = vld [vmem:[#allocation2 + $0xb] sm:$0xff] }
 0x240   : > { %v641_v34 = vld [vmem:[#allocation2 + $0x5] sm:$0xff]  ;;  %2931 = vmatmul.mubr.f32.vlgmr.msra.gmra.mrb[4].mxu1 %v643_v33 }
 0x241   : > { %762 = vmatmul.mubr.f32.vlgmr.msra.gmra.mrb[6].mxu0 %v641_v34  ;;  %3424 = vmatpush3.bf16.msra.mxu1 %v3423_v60  ;;  %v972_v33 = vld [vmem:[#allocation3 + $0x6a8] sm:$0xff] }
 0x242   : > { %3399 = vmatpush3.bf16.msra.mxu0 %v3398_v30  ;;  %2965 = vmatprep.mubr.msk.f32.mxu0 %vm3982_vm1, %v3980_v0  ;;  %v970_v30 = vld [vmem:[#allocation3 + $0x698] sm:$0xff]  ;;  %v3460_v34 = vpack.c.bf16 %v972_v33, %v971_v32  ;;  %v980_v60 = vld [vmem:[#allocation3 + $0x6e8] sm:$0xff]  ;;  %v1137_v32 = vld [vmem:[#allocation3 + $0x740] sm:$0xff] }
 0x243   : > { %3400 = vmatprep.subr.bf16.mxu0 %v3981_v53  ;;  %3426 = vmatprep.subr.bf16.mxu1 %v3425_v63  ;;  %v3457_v31 = vpack.c.bf16 %v970_v30, %v969_v29  ;;  %v3472_v62 = vpack.c.bf16 %v980_v60, %v979_v59  ;;  %v948_v63 = vld [vmem:[#allocation3 + $0x5e8] sm:$0xff]  ;;  %v1135_v29 = vld [vmem:[#allocation3 + $0x730] sm:$0xff]  ;;  %v1136_v30 = vld [vmem:[#allocation3 + $0x738] sm:$0xff] }
 0x244   : > { %v1138_v33 = vld [vmem:[#allocation3 + $0x748] sm:$0xff]  ;;  %v1246_v59 = vld [vmem:[#allocation3 + $0x820] sm:$0xff] }
 0x245   : > { %3428 = vmatpush3.bf16.msra.mxu1 %v3427_v3  ;;  %v3447_v3 = vpack.c.bf16 %v948_v63, %v947_v61  ;;  %v1247_v60 = vld [vmem:[#allocation3 + $0x828] sm:$0xff] }
 0x246   : > { %3402 = vmatpush3.bf16.msra.mxu0 %v3401_v35  ;;  %3430 = vmatprep.subr.bf16.mxu1 %v3429_v6  ;;  %v973_v35 = vld [vmem:[#allocation3 + $0x6b0] sm:$0xff]  ;;  %v982_v6 = vld [vmem:[#allocation3 + $0x6f8] sm:$0xff]  ;;  %v3509_v61 = vpack.c.bf16 %v1247_v60, %v1246_v59  ;;  %v1231_v63 = vld [vmem:[#allocation3 + $0x7a8] sm:$0xff] }
 0x247   : > { %3403 = vmatprep.subr.bf16.mxu0 %v3981_v53  ;;  %v3463_v37 = vpack.c.bf16 %v974_v36, %v973_v35  ;;  %v3475_v8 = vpack.c.bf16 %v982_v6, %v981_v5  ;;  %v1139_v35 = vld [vmem:[#allocation3 + $0x750] sm:$0xff]  ;;  %v1140_v36 = vld [vmem:[#allocation3 + $0x758] sm:$0xff] }
 0x248   : > { %v1232_v5 = vld [vmem:[#allocation3 + $0x7b0] sm:$0xff]  ;;  %v1233_v6 = vld [vmem:[#allocation3 + $0x7b8] sm:$0xff] }
 0x249   : > { %3432 = vmatpush3.bf16.msra.mxu1 %v3431_v9  ;;  %v950_v9 = vld [vmem:[#allocation3 + $0x5f8] sm:$0xff] }
 0x24a   : > { %3405 = vmatpush3.bf16.msra.mxu0 %v3404_v38  ;;  %3434 = vmatprep.subr.bf16.mxu1 %v3433_v12  ;;  %v959_v38 = vld [vmem:[#allocation3 + $0x640] sm:$0xff]  ;;  %v3451_v10 = vpack.c.bf16 %v950_v9, %v949_v7  ;;  %v3515_v7 = vpack.c.bf16 %v1233_v6, %v1232_v5  ;;  %v1251_v9 = vld [vmem:[#allocation3 + $0x848] sm:$0xff] }
 0x24b   : > { %3406 = vmatprep.subr.bf16.mxu0 %v3981_v53  ;;  %v1287_v5 = vld [vmem:[#allocation3 + $0x968] sm:$0xff]  ;;  %v1238_v6 = vld [vmem:[#allocation3 + $0x7e0] sm:$0xff] }
 0x24d   : > { %3436 = vmatpush3.bf16.msra.mxu1 %v3435_v15 }
 0x24e   : > { %3408 = vmatpush3.bf16.msra.mxu0 %v3407_v41  ;;  %v976_v41 = vld [vmem:[#allocation3 + $0x6c8] sm:$0xff] }
 0x24f   : > { %3409 = vmatprep.subr.bf16.mxu0 %v3981_v53  ;;  %v3466_v43 = vpack.c.bf16 %v976_v41, %v975_v40  ;;  %v1143_v40 = vld [vmem:[#allocation3 + $0x770] sm:$0xff]  ;;  %v1144_v41 = vld [vmem:[#allocation3 + $0x778] sm:$0xff] }
 0x252   : > { %3411 = vmatpush3.bf16.msra.mxu0 %v3410_v44  ;;  %v944_v44 = vld [vmem:[#allocation3 + $0x5c8] sm:$0xff] }
 0x253   : > { %3412 = vmatprep.subr.bf16.mxu0 %v3981_v53  ;;  %v3439_v45 = vpack.c.bf16 %v944_v44, %v943_v42  ;;  %v3499_v42 = vpack.c.bf16 %v1144_v41, %v1143_v40  ;;  %v1243_v44 = vld [vmem:[#allocation3 + $0x808] sm:$0xff] }
 0x256   : > { %3414 = vmatpush3.bf16.msra.mxu0 %v3413_v47  ;;  %v962_v47 = vld [vmem:[#allocation3 + $0x658] sm:$0xff] }
 0x257   : > { %3415 = vmatprep.subr.bf16.mxu0 %v3981_v53  ;;  %v3441_v48 = vpack.c.bf16 %v962_v47, %v961_v46  ;;  %v1275_v47 = vld [vmem:[#allocation3 + $0x908] sm:$0xff] }
 0x25a   : > { %3417 = vmatpush3.bf16.msra.mxu0 %v3416_v50  ;;  %v978_v50 = vld [vmem:[#allocation3 + $0x6d8] sm:$0xff] }
 0x25b   : > { %3418 = vmatprep.subr.bf16.mxu0 %v3981_v53  ;;  %v3469_v52 = vpack.c.bf16 %v978_v50, %v977_v49  ;;  %v1227_v49 = vld [vmem:[#allocation3 + $0x788] sm:$0xff] }
 0x25e   : > { %3420 = vmatpush3.bf16.msra.mxu0 %v3419_v54  ;;  %v946_v54 = vld [vmem:[#allocation3 + $0x5d8] sm:$0xff] }
 0x25f   : > { %3453 = vmatprep.subr.bf16.mxu0 %v3981_v53  ;;  %v3443_v55 = vpack.c.bf16 %v946_v54, %v945_v51  ;;  %v1245_v54 = vld [vmem:[#allocation3 + $0x818] sm:$0xff] }
 0x313   : > { %v833_v16 = vpop.f32.mrb[4].mxu1 }
 0x314   : > { %v2497_v17 = vpop.f32.mrb[6].mxu0  ;;  %v2932_v18 = vpop.f32.mrb[5].mxu1 }
 0x315   : > { %v2498_v20 = vpop.f32.mrb[7].mxu0  ;;  %v1130_v18 = vld [vmem:[#allocation3 + $0x708] sm:$0xff] }
 0x316   : > { %v2499_v21 = vadd.f32 %v2498_v20, %v2497_v17  ;;  %v1129_v17 = vld [vmem:[#allocation3 + $0x700] sm:$0xff]  ;;  %v1131_v20 = vld [vmem:[#allocation3 + $0x710] sm:$0xff] }
 0x318   : > { %v764_v22 = vadd.f32 %v2499_v21, %v2324_v19  ;;  %v3478_v19 = vpack.c.bf16 %v1130_v18, %v1129_v17  ;;  %v1132_v21 = vld [vmem:[#allocation3 + $0x718] sm:$0xff]  ;;  %v2326_v18 = vld [vmem:[#allocation6 + $0x4] ss:$0 sm:$0xff] }
 0x319   : > { %v3481_v24 = vpack.c.bf16 %v1132_v21, %v1131_v20 }
 0x31a   : > { %v834_v25 = vadd.f32 %v833_v16, %v764_v22 }
 0x31c   : > { %v837_v28 = vmax.f32 %v834_v25, 0.0  ;;  %v4176_v25 = vld [vmem:[#allocation2] sm:$0xff] }
 0x31e   : > { %2966 = vmatmul.mubr.f32.vlgmr.msra.gmra.mrb[8].mxu0 %v837_v28 }
 0x31f   : > { %3455 = vmatpush3.bf16.msra.mxu0 %v3454_v27  ;;  %3000 = vmatprep.mubr.msk.f32.mxu0 %vm3982_vm1, %v3980_v0  ;;  %v3437_v0 = vpack.c.bf16 %v960_v39, %v959_v38  ;;  %v1134_v27 = vld [vmem:[#allocation3 + $0x728] sm:$0xff]  ;;  %v1141_v38 = vld [vmem:[#allocation3 + $0x760] sm:$0xff] }
 0x320   : > { %3456 = vmatprep.subr.bf16.mxu0 %v3981_v53  ;;  %v1142_v39 = vld [vmem:[#allocation3 + $0x768] sm:$0xff] }
 0x321   : > { %3438 = vmatprep.subr.bf16.mxu1 %v3437_v0  ;;  %v3496_v0 = vpack.c.bf16 %v1142_v39, %v1141_v38  ;;  %v1263_v38 = vld [vmem:[#allocation3 + $0x8a8] sm:$0xff]  ;;  %v1280_v39 = vld [vmem:[#allocation3 + $0x930] sm:$0xff] }
 0x322   : > { %3440 = vmatpush3.bf16.msra.mxu1 %v3439_v45  ;;  %v1274_v45 = vld [vmem:[#allocation3 + $0x900] sm:$0xff] }
 0x323   : > { %3458 = vmatpush3.bf16.msra.mxu0 %v3457_v31  ;;  %3442 = vmatprep.subr.bf16.mxu1 %v3441_v48  ;;  %v3487_v31 = vpack.c.bf16 %v1136_v30, %v1135_v29  ;;  %v1226_v48 = vld [vmem:[#allocation3 + $0x780] sm:$0xff]  ;;  %v3533_v50 = vpack.c.bf16 %v1275_v47, %v1274_v45  ;;  %v1283_v45 = vld [vmem:[#allocation3 + $0x948] sm:$0xff] }
 0x324   : > { %3459 = vmatprep.subr.bf16.mxu0 %v3981_v53  ;;  %v3503_v51 = vpack.c.bf16 %v1227_v49, %v1226_v48  ;;  %v1266_v48 = vld [vmem:[#allocation3 + $0x8c0] sm:$0xff]  ;;  %v1267_v49 = vld [vmem:[#allocation3 + $0x8c8] sm:$0xff] }
 0x326   : > { %3444 = vmatpush3.bf16.msra.mxu1 %v3443_v55 }
 0x327   : > { %3461 = vmatpush3.bf16.msra.mxu0 %v3460_v34  ;;  %3446 = vmatprep.subr.bf16.mxu1 %v3445_v58  ;;  %v3490_v34 = vpack.c.bf16 %v1138_v33, %v1137_v32  ;;  %v3507_v58 = vpack.c.bf16 %v1229_v57, %v1228_v56  ;;  %v1261_v32 = vld [vmem:[#allocation3 + $0x898] sm:$0xff]  ;;  %v1278_v33 = vld [vmem:[#allocation3 + $0x920] sm:$0xff]  ;;  %v1236_v57 = vld [vmem:[#allocation3 + $0x7d0] sm:$0xff] }
 0x328   : > { %3462 = vmatprep.subr.bf16.mxu0 %v3981_v53  ;;  %v1285_v56 = vld [vmem:[#allocation3 + $0x958] sm:$0xff] }
 0x32a   : > { %3448 = vmatpush3.bf16.msra.mxu1 %v3447_v3  ;;  %v1249_v3 = vld [vmem:[#allocation3 + $0x838] sm:$0xff] }
 0x32b   : > { %3464 = vmatpush3.bf16.msra.mxu0 %v3463_v37  ;;  %3450 = vmatprep.subr.bf16.mxu1 %v3449_v4  ;;  %v3493_v37 = vpack.c.bf16 %v1140_v36, %v1139_v35  ;;  %v3513_v4 = vpack.c.bf16 %v1249_v3, %v1248_v2  ;;  %v1255_v2 = vld [vmem:[#allocation3 + $0x868] sm:$0xff]  ;;  %v1286_v3 = vld [vmem:[#allocation3 + $0x960] sm:$0xff] }
 0x32c   : > { %3465 = vmatprep.subr.bf16.mxu0 %v3981_v53 }
 0x32e   : > { %3452 = vmatpush3.bf16.msra.mxu1 %v3451_v10 }
 0x32f   : > { %3467 = vmatpush3.bf16.msra.mxu0 %v3466_v43  ;;  %3477 = vmatprep.subr.bf16.mxu1 %v3981_v53  ;;  %v1242_v43 = vld [vmem:[#allocation3 + $0x800] sm:$0xff] }
 0x330   : > { %3468 = vmatprep.subr.bf16.mxu0 %v3981_v53  ;;  %v3501_v46 = vpack.c.bf16 %v1243_v44, %v1242_v43  ;;  %v1265_v43 = vld [vmem:[#allocation3 + $0x8b8] sm:$0xff]  ;;  %v1282_v44 = vld [vmem:[#allocation3 + $0x940] sm:$0xff] }
 0x331   : > { %v3549_v47 = vpack.c.bf16 %v1283_v45, %v1282_v44  ;;  %v1444_v45 = vld [vmem:[#allocation3 + $0x998] sm:$0xff] }
 0x333   : > { %3470 = vmatpush3.bf16.msra.mxu0 %v3469_v52  ;;  %v1244_v52 = vld [vmem:[#allocation3 + $0x810] sm:$0xff] }
 0x334   : > { %3471 = vmatprep.subr.bf16.mxu0 %v3981_v53  ;;  %v3505_v55 = vpack.c.bf16 %v1245_v54, %v1244_v52  ;;  %v1253_v52 = vld [vmem:[#allocation3 + $0x858] sm:$0xff]  ;;  %v1284_v54 = vld [vmem:[#allocation3 + $0x950] sm:$0xff] }
 0x335   : > { %v3553_v59 = vpack.c.bf16 %v1285_v56, %v1284_v54 }
 0x337   : > { %3473 = vmatpush3.bf16.msra.mxu0 %v3472_v62  ;;  %v1230_v62 = vld [vmem:[#allocation3 + $0x7a0] sm:$0xff] }
 0x338   : > { %3474 = vmatprep.subr.bf16.mxu0 %v3981_v53  ;;  %v3511_v1 = vpack.c.bf16 %v1231_v63, %v1230_v62  ;;  %v1269_v62 = vld [vmem:[#allocation3 + $0x8d8] sm:$0xff] }
 0x33b   : > { %3476 = vmatpush3.bf16.msra.mxu0 %v3475_v8  ;;  %v1250_v8 = vld [vmem:[#allocation3 + $0x840] sm:$0xff] }
 0x33c   : > { %3502 = vmatprep.subr.bf16.mxu0 %v3501_v46  ;;  %v3517_v10 = vpack.c.bf16 %v1251_v9, %v1250_v8  ;;  %v3557_v8 = vpack.c.bf16 %v1287_v5, %v1286_v3  ;;  %v1480_v3 = vld [vmem:[#allocation3 + $0xab8] sm:$0xff]  ;;  %v1447_v5 = vld [vmem:[#allocation3 + $0x9b0] sm:$0xff] }
 0x3f1   : > { %v925_v12 = vpop.f32.mrb[8].mxu0 }
 0x3f2   : > { %v926_v13 = vadd.f32 %v2325_v11, %v925_v12  ;;  %v2967_v14 = vpop.f32.mrb[9].mxu0  ;;  %v1234_v11 = vld [vmem:[#allocation3 + $0x7c0] sm:$0xff]  ;;  %v1235_v12 = vld [vmem:[#allocation3 + $0x7c8] sm:$0xff] }
 0x3f4   : > { %v4173_v15 = vadd.f32 %v926_v13, %v4149_v26  ;;  %v1133_v26 = vld [vmem:[#allocation3 + $0x720] sm:$0xff]  ;;  %v3519_v13 = vpack.c.bf16 %v1235_v12, %v1234_v11  ;;  %v1271_v11 = vld [vmem:[#allocation3 + $0x8e8] sm:$0xff]  ;;  %v1256_v12 = vld [vmem:[#allocation3 + $0x870] sm:$0xff] }
 0x3f5   : > { %v3484_v28 = vpack.c.bf16 %v1134_v27, %v1133_v26  ;;  %v1277_v26 = vld [vmem:[#allocation3 + $0x918] sm:$0xff] }
 0x3f6   : > { %v930_v16 = vmax.f32 %v4173_v15, 0.0 }
 0x3f8   : > { %931 = vst [vmem:[#allocation2 + $0x8] sm:$0xff] %v930_v16  ;;  %1052 = vmatprep.mubr.f32.mxu1 %v930_v16 }
 0x3ff   : > { %v934_v22 = vld [vmem:[#allocation2 + $0x9] sm:$0xff] }
 0x400   : > { %v932_v23 = vld [vmem:[#allocation2 + $0x7] sm:$0xff]  ;;  %3001 = vmatmul.mubr.f32.vlgmr.msra.gmra.mrb[10].mxu0 %v934_v22 }
 0x401   : > { %1053 = vmatmul.mubr.f32.vlgmr.msra.gmra.mrb[6].mxu1 %v932_v23  ;;  %3504 = vmatpush3.bf16.msra.mxu0 %v3503_v51  ;;  %v1258_v22 = vld [vmem:[#allocation3 + $0x880] sm:$0xff]  ;;  %v1259_v23 = vld [vmem:[#allocation3 + $0x888] sm:$0xff]  ;;  %v1252_v51 = vld [vmem:[#allocation3 + $0x850] sm:$0xff] }
 0x402   : > { %3479 = vmatpush3.bf16.msra.mxu1 %v3478_v19  ;;  %3035 = vmatprep.mubr.msk.f32.mxu1 %vm3982_vm1, %v4176_v25 }
 0x403   : > { %3480 = vmatprep.subr.bf16.mxu1 %v3981_v53  ;;  %3506 = vmatprep.subr.bf16.mxu0 %v3505_v55  ;;  %v3521_v55 = vpack.c.bf16 %v1253_v52, %v1252_v51 }
 0x405   : > { %3508 = vmatpush3.bf16.msra.mxu0 %v3507_v58  ;;  %v1237_v58 = vld [vmem:[#allocation3 + $0x7d8] sm:$0xff] }
 0x406   : > { %3482 = vmatpush3.bf16.msra.mxu1 %v3481_v24  ;;  %3510 = vmatprep.subr.bf16.mxu0 %v3509_v61  ;;  %v1276_v24 = vld [vmem:[#allocation3 + $0x910] sm:$0xff]  ;;  %v3523_v60 = vpack.c.bf16 %v1237_v58, %v1236_v57  ;;  %v1478_v57 = vld [vmem:[#allocation3 + $0xaa8] sm:$0xff]  ;;  %v1445_v58 = vld [vmem:[#allocation3 + $0x9a0] sm:$0xff] }
 0x407   : > { %3483 = vmatprep.subr.bf16.mxu1 %v3981_v53  ;;  %v3537_v30 = vpack.c.bf16 %v1277_v26, %v1276_v24  ;;  %v1268_v61 = vld [vmem:[#allocation3 + $0x8d0] sm:$0xff]  ;;  %v1273_v24 = vld [vmem:[#allocation3 + $0x8f8] sm:$0xff] }
 0x408   : > { %v3555_v63 = vpack.c.bf16 %v1269_v62, %v1268_v61  ;;  %v1464_v61 = vld [vmem:[#allocation3 + $0xa38] sm:$0xff] }
 0x409   : > { %3512 = vmatpush3.bf16.msra.mxu0 %v3511_v1  ;;  %v1254_v1 = vld [vmem:[#allocation3 + $0x860] sm:$0xff] }
 0x40a   : > { %3485 = vmatpush3.bf16.msra.mxu1 %v3484_v28  ;;  %3514 = vmatprep.subr.bf16.mxu0 %v3513_v4  ;;  %v3535_v28 = vpack.c.bf16 %v1259_v23, %v1258_v22  ;;  %v3525_v4 = vpack.c.bf16 %v1255_v2, %v1254_v1  ;;  %v1272_v22 = vld [vmem:[#allocation3 + $0x8f0] sm:$0xff] }
 0x40b   : > { %3486 = vmatprep.subr.bf16.mxu1 %v3981_v53  ;;  %v3563_v26 = vpack.c.bf16 %v1273_v24, %v1272_v22  ;;  %v1479_v2 = vld [vmem:[#allocation3 + $0xab0] sm:$0xff]  ;;  %v1484_v22 = vld [vmem:[#allocation3 + $0xad8] sm:$0xff] }
 0x40c   : > { %v1452_v24 = vld [vmem:[#allocation3 + $0x9d8] sm:$0xff] }
 0x40d   : > { %3516 = vmatpush3.bf16.msra.mxu0 %v3515_v7  ;;  %v1239_v7 = vld [vmem:[#allocation3 + $0x7e8] sm:$0xff] }
 0x40e   : > { %3488 = vmatpush3.bf16.msra.mxu1 %v3487_v31  ;;  %3518 = vmatprep.subr.bf16.mxu0 %v3517_v10  ;;  %v1260_v31 = vld [vmem:[#allocation3 + $0x890] sm:$0xff]  ;;  %v3527_v9 = vpack.c.bf16 %v1239_v7, %v1238_v6  ;;  %v1270_v10 = vld [vmem:[#allocation3 + $0x8e0] sm:$0xff]  ;;  %v1448_v6 = vld [vmem:[#allocation3 + $0x9b8] sm:$0xff] }
 0x40f   : > { %3489 = vmatprep.subr.bf16.mxu1 %v3981_v53  ;;  %v3539_v35 = vpack.c.bf16 %v1261_v32, %v1260_v31  ;;  %v3579_v7 = vpack.c.bf16 %v1448_v6, %v1447_v5  ;;  %v1642_v5 = vld [vmem:[#allocation3 + $0xb38] sm:$0xff] }
 0x411   : > { %3520 = vmatpush3.bf16.msra.mxu0 %v3519_v13  ;;  %v3559_v13 = vpack.c.bf16 %v1271_v11, %v1270_v10  ;;  %v1481_v10 = vld [vmem:[#allocation3 + $0xac0] sm:$0xff] }
 0x412   : > { %3491 = vmatpush3.bf16.msra.mxu1 %v3490_v34  ;;  %v1279_v34 = vld [vmem:[#allocation3 + $0x928] sm:$0xff]  ;;  %3522 = vmatprep.subr.bf16.mxu0 %v3521_v55  ;;  %v1477_v55 = vld [vmem:[#allocation3 + $0xaa0] sm:$0xff] }
 0x413   : > { %3492 = vmatprep.subr.bf16.mxu1 %v3981_v53  ;;  %v3541_v36 = vpack.c.bf16 %v1279_v34, %v1278_v33  ;;  %v3604_v62 = vpack.c.bf16 %v1478_v57, %v1477_v55  ;;  %v1635_v55 = vld [vmem:[#allocation3 + $0xb00] sm:$0xff] }
 0x415   : > { %3524 = vmatpush3.bf16.msra.mxu0 %v3523_v60  ;;  %v1463_v60 = vld [vmem:[#allocation3 + $0xa30] sm:$0xff] }
 0x416   : > { %3494 = vmatpush3.bf16.msra.mxu1 %v3493_v37  ;;  %v1262_v37 = vld [vmem:[#allocation3 + $0x8a0] sm:$0xff]  ;;  %3526 = vmatprep.subr.bf16.mxu0 %v3525_v4  ;;  %v3577_v1 = vpack.c.bf16 %v1464_v61, %v1463_v60  ;;  %v3607_v4 = vpack.c.bf16 %v1480_v3, %v1479_v2  ;;  %v1640_v2 = vld [vmem:[#allocation3 + $0xb28] sm:$0xff] }
 0x417   : > { %3495 = vmatprep.subr.bf16.mxu1 %v3981_v53  ;;  %v3543_v40 = vpack.c.bf16 %v1263_v38, %v1262_v37  ;;  %v1441_v37 = vld [vmem:[#allocation3 + $0x980] sm:$0xff]  ;;  %v1442_v38 = vld [vmem:[#allocation3 + $0x988] sm:$0xff] }
 0x418   : > { %v3567_v44 = vpack.c.bf16 %v1442_v38, %v1441_v37  ;;  %v1471_v37 = vld [vmem:[#allocation3 + $0xa70] sm:$0xff]  ;;  %v1472_v38 = vld [vmem:[#allocation3 + $0xa78] sm:$0xff] }
 0x419   : > { %3528 = vmatpush3.bf16.msra.mxu0 %v3527_v9  ;;  %v1466_v9 = vld [vmem:[#allocation3 + $0xa48] sm:$0xff] }
 0x41a   : > { %3497 = vmatpush3.bf16.msra.mxu1 %v3496_v0  ;;  %v1281_v0 = vld [vmem:[#allocation3 + $0x938] sm:$0xff] }
 0x41b   : > { %3498 = vmatprep.subr.bf16.mxu1 %v3981_v53  ;;  %v3545_v41 = vpack.c.bf16 %v1281_v0, %v1280_v39  ;;  %v1459_v39 = vld [vmem:[#allocation3 + $0xa10] sm:$0xff]  ;;  %v1460_v0 = vld [vmem:[#allocation3 + $0xa18] sm:$0xff] }
 0x41e   : > { %3500 = vmatpush3.bf16.msra.mxu1 %v3499_v42  ;;  %v1264_v42 = vld [vmem:[#allocation3 + $0x8b0] sm:$0xff] }
 0x41f   : > { %3534 = vmatprep.subr.bf16.mxu1 %v3533_v50  ;;  %v3547_v46 = vpack.c.bf16 %v1265_v43, %v1264_v42  ;;  %v3551_v50 = vpack.c.bf16 %v1267_v49, %v1266_v48  ;;  %v1443_v42 = vld [vmem:[#allocation3 + $0x990] sm:$0xff] }
 0x420   : > { %v3571_v54 = vpack.c.bf16 %v1444_v45, %v1443_v42  ;;  %v1456_v42 = vld [vmem:[#allocation3 + $0x9f8] sm:$0xff] }
 0x4d3   : > { %v1124_v14 = vpop.f32.mrb[10].mxu0 }
 0x4d4   : > { %v2566_v16 = vpop.f32.mrb[6].mxu1  ;;  %v3002_v17 = vpop.f32.mrb[11].mxu0 }
 0x4d5   : > { %v2567_v19 = vpop.f32.mrb[7].mxu1  ;;  %v1289_v17 = vld [vmem:[#allocation3 + $0x978] sm:$0xff] }
 0x4d6   : > { %v2568_v20 = vadd.f32 %v2567_v19, %v2566_v16  ;;  %v1288_v16 = vld [vmem:[#allocation3 + $0x970] sm:$0xff] }
 0x4d7   : > { %v3561_v19 = vpack.c.bf16 %v1289_v17, %v1288_v16 }
 0x4d8   : > { %v1055_v21 = vadd.f32 %v2568_v20, %v2326_v18  ;;  %v1240_v20 = vld [vmem:[#allocation3 + $0x7f0] sm:$0xff] }
 0x4da   : > { %v1125_v27 = vadd.f32 %v1124_v14, %v1055_v21  ;;  %v1257_v14 = vld [vmem:[#allocation3 + $0x878] sm:$0xff] }
 0x4db   : > { %v3529_v18 = vpack.c.bf16 %v1257_v14, %v1256_v12  ;;  %v1241_v21 = vld [vmem:[#allocation3 + $0x7f8] sm:$0xff]  ;;  %v1482_v12 = vld [vmem:[#allocation3 + $0xac8] sm:$0xff] }
 0x4dc   : > { %v1128_v29 = vmax.f32 %v1125_v27, 0.0  ;;  %v3531_v23 = vpack.c.bf16 %v1241_v21, %v1240_v20  ;;  %v1457_v27 = vld [vmem:[#allocation3 + $0xa00] sm:$0xff]  ;;  %v1450_v14 = vld [vmem:[#allocation3 + $0x9c8] sm:$0xff]  ;;  %v3610_v16 = vpack.c.bf16 %v1482_v12, %v1481_v10  ;;  %v1483_v20 = vld [vmem:[#allocation3 + $0xad0] sm:$0xff] }
 0x4dd   : > { %3530 = vmatprep.subr.bf16.mxu0 %v3529_v18  ;;  %v1467_v18 = vld [vmem:[#allocation3 + $0xa50] sm:$0xff] }
 0x4de   : > { %3036 = vmatmul.mubr.f32.vlgmr.msra.gmra.mrb[8].mxu1 %v1128_v29  ;;  %3532 = vmatpush3.bf16.msra.mxu0 %v3531_v23  ;;  %v1451_v23 = vld [vmem:[#allocation3 + $0x9d0] sm:$0xff] }
 0x4df   : > { %3536 = vmatpush3.bf16.msra.mxu1 %v3535_v28  ;;  %v1458_v28 = vld [vmem:[#allocation3 + $0xa08] sm:$0xff]  ;;  %v1645_v10 = vld [vmem:[#allocation3 + $0xb50] sm:$0xff] }
 0x4e0   : > { %3538 = vmatprep.subr.bf16.mxu1 %v3537_v30  ;;  %v3565_v29 = vpack.c.bf16 %v1458_v28, %v1457_v27  ;;  %v2327_v30 = vld [vmem:[#allocation6 + $0x5] ss:$0 sm:$0xff]  ;;  %v3587_v27 = vpack.c.bf16 %v1452_v24, %v1451_v23  ;;  %v1733_v24 = vld [vmem:[#allocation3 + $0xb88] sm:$0xff] }
 0x4e1   : > { %v1469_v28 = vld [vmem:[#allocation3 + $0xa60] sm:$0xff] }
 0x4e2   : > { %3566 = vmatprep.subr.bf16.mxu0 %v3565_v29  ;;  %v1470_v29 = vld [vmem:[#allocation3 + $0xa68] sm:$0xff]  ;;  %v1732_v23 = vld [vmem:[#allocation3 + $0xb80] sm:$0xff] }
 0x4e3   : > { %3540 = vmatpush3.bf16.msra.mxu1 %v3539_v35  ;;  %v1473_v35 = vld [vmem:[#allocation3 + $0xa80] sm:$0xff] }
 0x4e4   : > { %3542 = vmatprep.subr.bf16.mxu1 %v3541_v36  ;;  %v1474_v36 = vld [vmem:[#allocation3 + $0xa88] sm:$0xff] }
 0x4e5   : > { %v3598_v43 = vpack.c.bf16 %v1474_v36, %v1473_v35 }
 0x4e7   : > { %3544 = vmatpush3.bf16.msra.mxu1 %v3543_v40  ;;  %v1475_v40 = vld [vmem:[#allocation3 + $0xa90] sm:$0xff] }
 0x4e8   : > { %3546 = vmatprep.subr.bf16.mxu1 %v3545_v41  ;;  %v1476_v41 = vld [vmem:[#allocation3 + $0xa98] sm:$0xff] }
 0x4e9   : > { %v3601_v52 = vpack.c.bf16 %v1476_v41, %v1475_v40  ;;  %v1488_v40 = vld [vmem:[#allocation3 + $0xaf8] sm:$0xff]  ;;  %v1455_v41 = vld [vmem:[#allocation3 + $0x9f0] sm:$0xff] }
 0x4eb   : > { %3548 = vmatpush3.bf16.msra.mxu1 %v3547_v46  ;;  %v1461_v46 = vld [vmem:[#allocation3 + $0xa20] sm:$0xff] }
 0x4ec   : > { %3550 = vmatprep.subr.bf16.mxu1 %v3549_v47  ;;  %v1462_v47 = vld [vmem:[#allocation3 + $0xa28] sm:$0xff] }
 0x4ed   : > { %v3573_v56 = vpack.c.bf16 %v1462_v47, %v1461_v46  ;;  %v2328_v47 = vld [vmem:[#allocation6 + $0x6] ss:$0 sm:$0xff] }
 0x4ef   : > { %3552 = vmatpush3.bf16.msra.mxu1 %v3551_v50  ;;  %v3569_v50 = vpack.c.bf16 %v1460_v0, %v1459_v39  ;;  %v1487_v39 = vld [vmem:[#allocation3 + $0xaf0] sm:$0xff]  ;;  %v3593_v0 = vpack.c.bf16 %v1472_v38, %v1471_v37  ;;  %v1737_v37 = vld [vmem:[#allocation3 + $0xba8] sm:$0xff] }
 0x4f0   : > { %3554 = vmatprep.subr.bf16.mxu1 %v3553_v59  ;;  %v1446_v59 = vld [vmem:[#allocation3 + $0x9a8] sm:$0xff] }
 0x4f3   : > { %3556 = vmatpush3.bf16.msra.mxu1 %v3555_v63  ;;  %v3575_v63 = vpack.c.bf16 %v1446_v59, %v1445_v58  ;;  %v1637_v58 = vld [vmem:[#allocation3 + $0xb10] sm:$0xff]  ;;  %v1638_v59 = vld [vmem:[#allocation3 + $0xb18] sm:$0xff] }
 0x4f4   : > { %3558 = vmatprep.subr.bf16.mxu1 %v3557_v8  ;;  %v1465_v8 = vld [vmem:[#allocation3 + $0xa40] sm:$0xff] }
 0x4f5   : > { %v3581_v11 = vpack.c.bf16 %v1466_v9, %v1465_v8  ;;  %v1644_v8 = vld [vmem:[#allocation3 + $0xb48] sm:$0xff] }
 0x4f7   : > { %3560 = vmatpush3.bf16.msra.mxu1 %v3559_v13  ;;  %v1449_v13 = vld [vmem:[#allocation3 + $0x9c0] sm:$0xff] }
 0x4f8   : > { %3562 = vmatprep.subr.bf16.mxu1 %v3561_v19  ;;  %v3583_v17 = vpack.c.bf16 %v1450_v14, %v1449_v13  ;;  %v1468_v19 = vld [vmem:[#allocation3 + $0xa58] sm:$0xff]  ;;  %v1647_v13 = vld [vmem:[#allocation3 + $0xb60] sm:$0xff]  ;;  %v1648_v14 = vld [vmem:[#allocation3 + $0xb68] sm:$0xff] }
 0x4f9   : > { %v3585_v21 = vpack.c.bf16 %v1468_v19, %v1467_v18  ;;  %v1650_v18 = vld [vmem:[#allocation3 + $0xb78] sm:$0xff] }
 0x4fb   : > { %3564 = vmatpush3.bf16.msra.mxu1 %v3563_v26  ;;  %v3613_v26 = vpack.c.bf16 %v1484_v22, %v1483_v20  ;;  %v1748_v20 = vld [vmem:[#allocation3 + $0xc00] sm:$0xff] }
 0x4fc   : > { %3597 = vmatprep.subr.bf16.mxu1 %v3981_v53 }
 0x5b1   : > { %v1216_v31 = vpop.f32.mrb[8].mxu1 }
 0x5b2   : > { %v1217_v32 = vadd.f32 %v2327_v30, %v1216_v31  ;;  %v3037_v33 = vpop.f32.mrb[9].mxu1  ;;  %v1485_v30 = vld [vmem:[#allocation3 + $0xae0] sm:$0xff]  ;;  %v3589_v31 = vpack.c.bf16 %v1470_v29, %v1469_v28  ;;  %v1751_v28 = vld [vmem:[#allocation3 + $0xc18] sm:$0xff] }
 0x5b3   : > { %v1453_v33 = vld [vmem:[#allocation3 + $0x9e0] sm:$0xff] }
 0x5b4   : > { %v1220_v34 = vadd.f32 %v1217_v32, %v4173_v15  ;;  %v1486_v32 = vld [vmem:[#allocation3 + $0xae8] sm:$0xff] }
 0x5b5   : > { %v3616_v35 = vpack.c.bf16 %v1486_v32, %v1485_v30  ;;  %v1734_v30 = vld [vmem:[#allocation3 + $0xb90] sm:$0xff] }
 0x5b6   : > { %1221 = vst [vmem:[#allocation2 + $0x8] sm:$0xff] %v1220_v34  ;;  %v1454_v34 = vld [vmem:[#allocation3 + $0x9e8] sm:$0xff] }
 0x5b7   : > { %v3591_v36 = vpack.c.bf16 %v1454_v34, %v1453_v33  ;;  %v1752_v33 = vld [vmem:[#allocation3 + $0xc20] sm:$0xff]  ;;  %v1753_v34 = vld [vmem:[#allocation3 + $0xc28] sm:$0xff] }
 0x5bd   : > { %v1223_v48 = vld [vmem:[#allocation2 + $0x8] ss:$2 sm:$0xf]  ;;  %v1222_v15 = vld [vmem:[#allocation2 + $0x7] ss:$2 sm:$0xf] }
 0x5be   : > { %v1225_v49 = vld [vmem:[#allocation2 + $0xa] ss:$2 sm:$0xf]  ;;  %1359 = vmatprep.mubr.f32.mxu0 %v1223_v48  ;;  %v1224_v51 = vld [vmem:[#allocation2 + $0x9] ss:$2 sm:$0xf] }
 0x5bf   : > { %1429 = vmatprep.mubr.f32.mxu1 %v1225_v49  ;;  %1360 = vmatmul.mubr.f32.vlgmr.msra.gmra.mrb[12].mxu0 %v1222_v15  ;;  %1436 = vst [vmem:[#allocation2 + $0xc] sm:$0xf] %v4176_v25 }
 0x5c0   : > { %1430 = vmatmul.mubr.f32.vlgmr.msra.gmra.mrb[10].mxu1 %v1224_v51  ;;  %3568 = vmatpush3.bf16.msra.mxu0 %v3567_v44  ;;  %v3595_v44 = vpack.c.bf16 %v1456_v42, %v1455_v41  ;;  %v1738_v41 = vld [vmem:[#allocation3 + $0xbb0] sm:$0xff]  ;;  %v1739_v42 = vld [vmem:[#allocation3 + $0xbb8] sm:$0xff] }
 0x5c1   : > { %3599 = vmatpush3.bf16.msra.mxu1 %v3598_v43  ;;  %3570 = vmatprep.subr.bf16.mxu0 %v3569_v50  ;;  %v3619_v43 = vpack.c.bf16 %v1488_v40, %v1487_v39  ;;  %v1754_v39 = vld [vmem:[#allocation3 + $0xc30] sm:$0xff] }
 0x5c2   : > { %3600 = vmatprep.subr.bf16.mxu1 %v3981_v53  ;;  %3070 = vmatprep.mubr.msk.f32.mxu1 %vm3982_vm1, %v4176_v25 }
 0x5c4   : > { %3572 = vmatpush3.bf16.msra.mxu0 %v3571_v54 }
 0x5c5   : > { %3602 = vmatpush3.bf16.msra.mxu1 %v3601_v52  ;;  %3574 = vmatprep.subr.bf16.mxu0 %v3573_v56  ;;  %v1636_v56 = vld [vmem:[#allocation3 + $0xb08] sm:$0xff] }
 0x5c6   : > { %3603 = vmatprep.subr.bf16.mxu1 %v3981_v53  ;;  %v3622_v57 = vpack.c.bf16 %v1636_v56, %v1635_v55 }
 0x5c8   : > { %3576 = vmatpush3.bf16.msra.mxu0 %v3575_v63  ;;  %v3625_v63 = vpack.c.bf16 %v1638_v59, %v1637_v58  ;;  %v1767_v58 = vld [vmem:[#allocation3 + $0xc98] sm:$0xff] }
 0x5c9   : > { %3605 = vmatpush3.bf16.msra.mxu1 %v3604_v62  ;;  %3578 = vmatprep.subr.bf16.mxu0 %v3577_v1  ;;  %v1639_v1 = vld [vmem:[#allocation3 + $0xb20] sm:$0xff] }
 0x5ca   : > { %3606 = vmatprep.subr.bf16.mxu1 %v3981_v53  ;;  %v3628_v3 = vpack.c.bf16 %v1640_v2, %v1639_v1  ;;  %v1771_v1 = vld [vmem:[#allocation3 + $0xcb8] sm:$0xff] }
 0x5cc   : > { %3580 = vmatpush3.bf16.msra.mxu0 %v3579_v7  ;;  %v1643_v7 = vld [vmem:[#allocation3 + $0xb40] sm:$0xff] }
 0x5cd   : > { %3608 = vmatpush3.bf16.msra.mxu1 %v3607_v4  ;;  %3582 = vmatprep.subr.bf16.mxu0 %v3581_v11  ;;  %v1641_v4 = vld [vmem:[#allocation3 + $0xb30] sm:$0xff]  ;;  %v3634_v9 = vpack.c.bf16 %v1644_v8, %v1643_v7  ;;  %v1646_v11 = vld [vmem:[#allocation3 + $0xb58] sm:$0xff]  ;;  %v1773_v7 = vld [vmem:[#allocation3 + $0xcc8] sm:$0xff] }
 0x5ce   : > { %3609 = vmatprep.subr.bf16.mxu1 %v3981_v53  ;;  %v3631_v6 = vpack.c.bf16 %v1642_v5, %v1641_v4  ;;  %v3637_v12 = vpack.c.bf16 %v1646_v11, %v1645_v10  ;;  %v1757_v4 = vld [vmem:[#allocation3 + $0xc48] sm:$0xff]  ;;  %v1772_v5 = vld [vmem:[#allocation3 + $0xcc0] sm:$0xff] }
 0x5cf   : > { %v1740_v8 = vld [vmem:[#allocation3 + $0xbc0] sm:$0xff]  ;;  %v3690_v10 = vpack.c.bf16 %v1773_v7, %v1772_v5  ;;  %v1941_v7 = vld [vmem:[#allocation3 + $0xd78] sm:$0xff] }
 0x5d0   : > { %3584 = vmatpush3.bf16.msra.mxu0 %v3583_v17  ;;  %v1649_v17 = vld [vmem:[#allocation3 + $0xb70] sm:$0xff] }
 0x5d1   : > { %3611 = vmatpush3.bf16.msra.mxu1 %v3610_v16  ;;  %3586 = vmatprep.subr.bf16.mxu0 %v3585_v21  ;;  %v3640_v16 = vpack.c.bf16 %v1648_v14, %v1647_v13  ;;  %v3643_v19 = vpack.c.bf16 %v1650_v18, %v1649_v17  ;;  %v1749_v21 = vld [vmem:[#allocation3 + $0xc08] sm:$0xff]  ;;  %v1759_v13 = vld [vmem:[#allocation3 + $0xc58] sm:$0xff]  ;;  %v1774_v14 = vld [vmem:[#allocation3 + $0xcd0] sm:$0xff] }
 0x5d2   : > { %3612 = vmatprep.subr.bf16.mxu1 %v3981_v53  ;;  %v3645_v22 = vpack.c.bf16 %v1749_v21, %v1748_v20  ;;  %v1775_v17 = vld [vmem:[#allocation3 + $0xcd8] sm:$0xff]  ;;  %v1742_v18 = vld [vmem:[#allocation3 + $0xbd0] sm:$0xff] }
 0x5d3   : > { %v3693_v20 = vpack.c.bf16 %v1775_v17, %v1774_v14  ;;  %v2041_v17 = vld [vmem:[#allocation3 + $0xe18] sm:$0xff] }
 0x5d4   : > { %3588 = vmatpush3.bf16.msra.mxu0 %v3587_v27  ;;  %v1750_v27 = vld [vmem:[#allocation3 + $0xc10] sm:$0xff] }
 0x5d5   : > { %3614 = vmatpush3.bf16.msra.mxu1 %v3613_v26  ;;  %3590 = vmatprep.subr.bf16.mxu0 %v3589_v31  ;;  %v3647_v26 = vpack.c.bf16 %v1733_v24, %v1732_v23  ;;  %v3649_v29 = vpack.c.bf16 %v1751_v28, %v1750_v27  ;;  %v1735_v31 = vld [vmem:[#allocation3 + $0xb98] sm:$0xff]  ;;  %v1761_v23 = vld [vmem:[#allocation3 + $0xc68] sm:$0xff]  ;;  %v1776_v24 = vld [vmem:[#allocation3 + $0xce0] sm:$0xff] }
 0x5d6   : > { %3615 = vmatprep.subr.bf16.mxu1 %v3981_v53  ;;  %v3651_v32 = vpack.c.bf16 %v1735_v31, %v1734_v30  ;;  %v1777_v27 = vld [vmem:[#allocation3 + $0xce8] sm:$0xff]  ;;  %v1744_v28 = vld [vmem:[#allocation3 + $0xbe0] sm:$0xff] }
 0x5d7   : > { %v3696_v30 = vpack.c.bf16 %v1777_v27, %v1776_v24  ;;  %v2027_v27 = vld [vmem:[#allocation3 + $0xda8] sm:$0xff] }
 0x5d8   : > { %3592 = vmatpush3.bf16.msra.mxu0 %v3591_v36  ;;  %v1736_v36 = vld [vmem:[#allocation3 + $0xba0] sm:$0xff] }
 0x5d9   : > { %3617 = vmatpush3.bf16.msra.mxu1 %v3616_v35  ;;  %3594 = vmatprep.subr.bf16.mxu0 %v3593_v0  ;;  %v3653_v35 = vpack.c.bf16 %v1753_v34, %v1752_v33  ;;  %v3655_v38 = vpack.c.bf16 %v1737_v37, %v1736_v36  ;;  %v1755_v0 = vld [vmem:[#allocation3 + $0xc38] sm:$0xff]  ;;  %v1778_v34 = vld [vmem:[#allocation3 + $0xcf0] sm:$0xff] }
 0x5da   : > { %3618 = vmatprep.subr.bf16.mxu1 %v3981_v53  ;;  %v3657_v40 = vpack.c.bf16 %v1755_v0, %v1754_v39  ;;  %v1763_v33 = vld [vmem:[#allocation3 + $0xc78] sm:$0xff]  ;;  %v1746_v37 = vld [vmem:[#allocation3 + $0xbf0] sm:$0xff] }
 0x5db   : > { %v1779_v36 = vld [vmem:[#allocation3 + $0xcf8] sm:$0xff] }
 0x5dc   : > { %3596 = vmatpush3.bf16.msra.mxu0 %v3595_v44  ;;  %v3699_v39 = vpack.c.bf16 %v1779_v36, %v1778_v34  ;;  %v2047_v36 = vld [vmem:[#allocation3 + $0xe48] sm:$0xff] }
 0x5dd   : > { %3620 = vmatpush3.bf16.msra.mxu1 %v3619_v43  ;;  %3621 = vmatprep.subr.bf16.mxu0 %v3981_v53  ;;  %v3659_v43 = vpack.c.bf16 %v1739_v42, %v1738_v41 }
 0x5de   : > { %3646 = vmatprep.subr.bf16.mxu1 %v3645_v22  ;;  %v1760_v22 = vld [vmem:[#allocation3 + $0xc60] sm:$0xff] }
 0x692   : > { %v2635_v45 = vpop.f32.mrb[12].mxu0 }
 0x693   : > { %v2670_v46 = vpop.f32.mrb[10].mxu1  ;;  %v2636_v48 = vpop.f32.mrb[13].mxu0 }
 0x694   : > { %v2671_v49 = vpop.f32.mrb[11].mxu1  ;;  %v2637_v50 = vadd.f32 %v2636_v48, %v2635_v45 }
 0x695   : > { %v2672_v15 = vadd.f32 %v2671_v49, %v2670_v46 }
 0x696   : > { %v1362_v51 = vadd.f32 %v2637_v50, %v2328_v47  ;;  %v2329_v47 = vld [vmem:[#allocation6 + $0x7] ss:$0 sm:$0xff] }
 0x698   : > { %v4200_v52 = vadd.f32 %v2672_v15, %v1362_v51  ;;  %v1764_v15 = vld [vmem:[#allocation3 + $0xc80] sm:$0xff]  ;;  %v1765_v51 = vld [vmem:[#allocation3 + $0xc88] sm:$0xff] }
 0x699   : > { %v3678_v55 = vpack.c.bf16 %v1765_v51, %v1764_v15 }
 0x69a   : > { %v1435_v54 = vmax.f32 %v4200_v52, 0.0 }
 0x69c   : > { %1437 = vst [vmem:[#allocation2 + $0x8] sm:$0xf] %v1435_v54 }
 0x6a3   : > { %v1439_v60 = vld [vmem:[#allocation2 + $0x8] sm:$0xf] }
 0x6a4   : > { %v1440_v61 = vld [vmem:[#allocation2 + $0xb] sm:$0xf]  ;;  %v1438_v62 = vld [vmem:[#allocation2 + $0x5] sm:$0xf]  ;;  %1558 = vmatprep.mubr.f32.mxu0 %v1439_v60 }
 0x6a5   : > { %3071 = vmatmul.mubr.f32.vlgmr.msra.gmra.mrb[12].mxu1 %v1440_v61  ;;  %1559 = vmatmul.mubr.f32.vlgmr.msra.gmra.mrb[14].mxu0 %v1438_v62  ;;  %v1768_v60 = vld [vmem:[#allocation3 + $0xca0] sm:$0xff]  ;;  %v1769_v61 = vld [vmem:[#allocation3 + $0xca8] sm:$0xff] }
 0x6a6   : > { %3623 = vmatpush3.bf16.msra.mxu0 %v3622_v57  ;;  %3105 = vmatprep.mubr.msk.f32.mxu0 %vm3982_vm1, %v4176_v25  ;;  %v1766_v57 = vld [vmem:[#allocation3 + $0xc90] sm:$0xff]  ;;  %v3684_v62 = vpack.c.bf16 %v1769_v61, %v1768_v60  ;;  %v1934_v61 = vld [vmem:[#allocation3 + $0xd40] sm:$0xff] }
 0x6a7   : > { %3624 = vmatprep.subr.bf16.mxu0 %v3981_v53  ;;  %3648 = vmatpush3.bf16.msra.mxu1 %v3647_v26  ;;  %v3681_v59 = vpack.c.bf16 %v1767_v58, %v1766_v57  ;;  %v3669_v26 = vpack.c.bf16 %v1761_v23, %v1760_v22  ;;  %v1932_v58 = vld [vmem:[#allocation3 + $0xd30] sm:$0xff]  ;;  %v2042_v22 = vld [vmem:[#allocation3 + $0xe20] sm:$0xff]  ;;  %v2043_v23 = vld [vmem:[#allocation3 + $0xe28] sm:$0xff] }
 0x6a8   : > { %3650 = vmatprep.subr.bf16.mxu1 %v3649_v29  ;;  %v1745_v29 = vld [vmem:[#allocation3 + $0xbe8] sm:$0xff]  ;;  %v3733_v24 = vpack.c.bf16 %v2043_v23, %v2042_v22  ;;  %v2053_v22 = vld [vmem:[#allocation3 + $0xe78] sm:$0xff]  ;;  %v2068_v23 = vld [vmem:[#allocation3 + $0xef0] sm:$0xff] }
 0x6a9   : > { %v3671_v31 = vpack.c.bf16 %v1745_v29, %v1744_v28  ;;  %v2044_v29 = vld [vmem:[#allocation3 + $0xe30] sm:$0xff] }
 0x6aa   : > { %3626 = vmatpush3.bf16.msra.mxu0 %v3625_v63  ;;  %v1770_v63 = vld [vmem:[#allocation3 + $0xcb0] sm:$0xff] }
 0x6ab   : > { %3627 = vmatprep.subr.bf16.mxu0 %v3981_v53  ;;  %3652 = vmatpush3.bf16.msra.mxu1 %v3651_v32  ;;  %v3687_v2 = vpack.c.bf16 %v1771_v1, %v1770_v63  ;;  %v1762_v32 = vld [vmem:[#allocation3 + $0xc70] sm:$0xff]  ;;  %v1937_v1 = vld [vmem:[#allocation3 + $0xd58] sm:$0xff] }
 0x6ac   : > { %3654 = vmatprep.subr.bf16.mxu1 %v3653_v35  ;;  %v3673_v35 = vpack.c.bf16 %v1763_v33, %v1762_v32  ;;  %v2028_v32 = vld [vmem:[#allocation3 + $0xdb0] sm:$0xff]  ;;  %v2029_v33 = vld [vmem:[#allocation3 + $0xdb8] sm:$0xff] }
 0x6ad   : > { %v3739_v34 = vpack.c.bf16 %v2029_v33, %v2028_v32 }
 0x6ae   : > { %3629 = vmatpush3.bf16.msra.mxu0 %v3628_v3  ;;  %v1756_v3 = vld [vmem:[#allocation3 + $0xc40] sm:$0xff] }
 0x6af   : > { %3630 = vmatprep.subr.bf16.mxu0 %v3981_v53  ;;  %3656 = vmatpush3.bf16.msra.mxu1 %v3655_v38  ;;  %v1747_v38 = vld [vmem:[#allocation3 + $0xbf8] sm:$0xff] }
 0x6b0   : > { %3658 = vmatprep.subr.bf16.mxu1 %v3657_v40  ;;  %v3675_v0 = vpack.c.bf16 %v1747_v38, %v1746_v37  ;;  %v2330_v40 = vld [vmem:[#allocation6 + $0x8] ss:$0 sm:$0xff]  ;;  %v2030_v38 = vld [vmem:[#allocation3 + $0xdc0] sm:$0xff] }
 0x6b2   : > { %3632 = vmatpush3.bf16.msra.mxu0 %v3631_v6  ;;  %v3661_v6 = vpack.c.bf16 %v1757_v4, %v1756_v3  ;;  %v1938_v3 = vld [vmem:[#allocation3 + $0xd60] sm:$0xff]  ;;  %v1939_v4 = vld [vmem:[#allocation3 + $0xd68] sm:$0xff] }
 0x6b3   : > { %3633 = vmatprep.subr.bf16.mxu0 %v3981_v53  ;;  %3660 = vmatpush3.bf16.msra.mxu1 %v3659_v43  ;;  %v3720_v5 = vpack.c.bf16 %v1939_v4, %v1938_v3  ;;  %v2049_v3 = vld [vmem:[#allocation3 + $0xe58] sm:$0xff]  ;;  %v2064_v4 = vld [vmem:[#allocation3 + $0xed0] sm:$0xff] }
 0x6b4   : > { %3662 = vmatprep.subr.bf16.mxu1 %v3661_v6  ;;  %v1940_v6 = vld [vmem:[#allocation3 + $0xd70] sm:$0xff] }
 0x6b6   : > { %3635 = vmatpush3.bf16.msra.mxu0 %v3634_v9  ;;  %v1741_v9 = vld [vmem:[#allocation3 + $0xbc8] sm:$0xff] }
 0x6b7   : > { %3636 = vmatprep.subr.bf16.mxu0 %v3981_v53  ;;  %v3663_v11 = vpack.c.bf16 %v1741_v9, %v1740_v8  ;;  %v3723_v8 = vpack.c.bf16 %v1941_v7, %v1940_v6  ;;  %v2038_v9 = vld [vmem:[#allocation3 + $0xe00] sm:$0xff]  ;;  %v2065_v6 = vld [vmem:[#allocation3 + $0xed8] sm:$0xff]  ;;  %v2032_v7 = vld [vmem:[#allocation3 + $0xdd0] sm:$0xff] }
 0x6b9   : > { %3664 = vmatpush3.bf16.msra.mxu1 %v3663_v11 }
 0x6ba   : > { %3638 = vmatpush3.bf16.msra.mxu0 %v3637_v12  ;;  %v1758_v12 = vld [vmem:[#allocation3 + $0xc50] sm:$0xff] }
 0x6bb   : > { %3639 = vmatprep.subr.bf16.mxu0 %v3981_v53 }
 0x6be   : > { %3641 = vmatpush3.bf16.msra.mxu0 %v3640_v16  ;;  %v3665_v16 = vpack.c.bf16 %v1759_v13, %v1758_v12  ;;  %v2022_v12 = vld [vmem:[#allocation3 + $0xd80] sm:$0xff]  ;;  %v2023_v13 = vld [vmem:[#allocation3 + $0xd88] sm:$0xff] }
 0x6bf   : > { %3642 = vmatprep.subr.bf16.mxu0 %v3981_v53  ;;  %v3727_v14 = vpack.c.bf16 %v2023_v13, %v2022_v12  ;;  %v2051_v12 = vld [vmem:[#allocation3 + $0xe68] sm:$0xff]  ;;  %v2066_v13 = vld [vmem:[#allocation3 + $0xee0] sm:$0xff] }
 0x6c0   : > { %3666 = vmatprep.subr.bf16.mxu1 %v3665_v16  ;;  %v2040_v16 = vld [vmem:[#allocation3 + $0xe10] sm:$0xff] }
 0x6c2   : > { %3644 = vmatpush3.bf16.msra.mxu0 %v3643_v19  ;;  %v1743_v19 = vld [vmem:[#allocation3 + $0xbd8] sm:$0xff] }
 0x6c3   : > { %3677 = vmatprep.subr.bf16.mxu0 %v3981_v53  ;;  %v3667_v21 = vpack.c.bf16 %v1743_v19, %v1742_v18  ;;  %v3729_v18 = vpack.c.bf16 %v2041_v17, %v2040_v16  ;;  %v2024_v19 = vld [vmem:[#allocation3 + $0xd90] sm:$0xff]  ;;  %v2067_v16 = vld [vmem:[#allocation3 + $0xee8] sm:$0xff]  ;;  %v2034_v17 = vld [vmem:[#allocation3 + $0xde0] sm:$0xff] }
 0x6c5   : > { %3668 = vmatpush3.bf16.msra.mxu1 %v3667_v21 }
 0x6c6   : > { %3670 = vmatprep.subr.bf16.mxu1 %v3669_v26  ;;  %v2026_v26 = vld [vmem:[#allocation3 + $0xda0] sm:$0xff] }
 0x6c7   : > { %v3735_v28 = vpack.c.bf16 %v2027_v27, %v2026_v26  ;;  %v2069_v26 = vld [vmem:[#allocation3 + $0xef8] sm:$0xff]  ;;  %v2036_v27 = vld [vmem:[#allocation3 + $0xdf0] sm:$0xff] }
 0x6c9   : > { %3672 = vmatpush3.bf16.msra.mxu1 %v3671_v31 }
 0x6ca   : > { %3674 = vmatprep.subr.bf16.mxu1 %v3673_v35  ;;  %v2046_v35 = vld [vmem:[#allocation3 + $0xe40] sm:$0xff] }
 0x6cb   : > { %v3741_v37 = vpack.c.bf16 %v2047_v36, %v2046_v35 }
 0x6cd   : > { %3676 = vmatpush3.bf16.msra.mxu1 %v3675_v0 }
 0x6ce   : > { %3701 = vmatprep.subr.bf16.mxu1 %v3981_v53 }
 0x778   : > { %v1630_v44 = vpop.f32.mrb[12].mxu1  ;;  %v2705_v45 = vpop.f32.mrb[14].mxu0 }
 0x779   : > { %v3072_v46 = vpop.f32.mrb[13].mxu1  ;;  %v2706_v48 = vpop.f32.mrb[15].mxu0 }
 0x77a   : > { %v2707_v49 = vadd.f32 %v2706_v48, %v2705_v45  ;;  %v1926_v46 = vld [vmem:[#allocation3 + $0xd00] sm:$0xff] }
 0x77c   : > { %v1561_v50 = vadd.f32 %v2707_v49, %v2329_v47  ;;  %v1927_v47 = vld [vmem:[#allocation3 + $0xd08] sm:$0xff]  ;;  %v1928_v49 = vld [vmem:[#allocation3 + $0xd10] sm:$0xff] }
 0x77d   : > { %v3702_v48 = vpack.c.bf16 %v1927_v47, %v1926_v46 }
 0x77e   : > { %v1631_v54 = vadd.f32 %v1630_v44, %v1561_v50  ;;  %v1929_v50 = vld [vmem:[#allocation3 + $0xd18] sm:$0xff] }
 0x780   : > { %v1634_v56 = vmax.f32 %v1631_v54, 0.0 }
 0x782   : > { %3106 = vmatmul.mubr.f32.vlgmr.msra.gmra.mrb[16].mxu0 %v1634_v56  ;;  %v1931_v56 = vld [vmem:[#allocation3 + $0xd28] sm:$0xff] }
 0x783   : > { %3679 = vmatpush3.bf16.msra.mxu0 %v3678_v55  ;;  %3140 = vmatprep.mubr.msk.f32.mxu0 %vm3982_vm1, %v4176_v25  ;;  %v3705_v55 = vpack.c.bf16 %v1929_v50, %v1928_v49  ;;  %v2055_v49 = vld [vmem:[#allocation3 + $0xe88] sm:$0xff] }
 0x784   : > { %3680 = vmatprep.subr.bf16.mxu0 %v3981_v53 }
 0x787   : > { %3682 = vmatpush3.bf16.msra.mxu0 %v3681_v59  ;;  %v1933_v59 = vld [vmem:[#allocation3 + $0xd38] sm:$0xff] }
 0x788   : > { %3683 = vmatprep.subr.bf16.mxu0 %v3981_v53  ;;  %v3711_v60 = vpack.c.bf16 %v1933_v59, %v1932_v58  ;;  %v2059_v58 = vld [vmem:[#allocation3 + $0xea8] sm:$0xff] }
 0x78b   : > { %3685 = vmatpush3.bf16.msra.mxu0 %v3684_v62  ;;  %v1935_v62 = vld [vmem:[#allocation3 + $0xd48] sm:$0xff] }
 0x78c   : > { %3686 = vmatprep.subr.bf16.mxu0 %v3981_v53  ;;  %v3714_v63 = vpack.c.bf16 %v1935_v62, %v1934_v61  ;;  %v2061_v61 = vld [vmem:[#allocation3 + $0xeb8] sm:$0xff] }
 0x78f   : > { %3688 = vmatpush3.bf16.msra.mxu0 %v3687_v2 }
 0x790   : > { %3689 = vmatprep.subr.bf16.mxu0 %v3981_v53 }
 0x793   : > { %3691 = vmatpush3.bf16.msra.mxu0 %v3690_v10  ;;  %v2039_v10 = vld [vmem:[#allocation3 + $0xe08] sm:$0xff] }
 0x794   : > { %3692 = vmatprep.subr.bf16.mxu0 %v3981_v53  ;;  %v3725_v11 = vpack.c.bf16 %v2039_v10, %v2038_v9  ;;  %v3773_v9 = vpack.c.bf16 %v2065_v6, %v2064_v4 }
 0x797   : > { %3694 = vmatpush3.bf16.msra.mxu0 %v3693_v20  ;;  %v2025_v20 = vld [vmem:[#allocation3 + $0xd98] sm:$0xff] }
 0x798   : > { %3695 = vmatprep.subr.bf16.mxu0 %v3981_v53  ;;  %v3731_v21 = vpack.c.bf16 %v2025_v20, %v2024_v19  ;;  %v3776_v19 = vpack.c.bf16 %v2067_v16, %v2066_v13 }
 0x79b   : > { %3697 = vmatpush3.bf16.msra.mxu0 %v3696_v30  ;;  %v2045_v30 = vld [vmem:[#allocation3 + $0xe38] sm:$0xff] }
 0x79c   : > { %3698 = vmatprep.subr.bf16.mxu0 %v3981_v53  ;;  %v3737_v31 = vpack.c.bf16 %v2045_v30, %v2044_v29  ;;  %v3779_v29 = vpack.c.bf16 %v2069_v26, %v2068_v23 }
 0x79f   : > { %3700 = vmatpush3.bf16.msra.mxu0 %v3699_v39  ;;  %v2031_v39 = vld [vmem:[#allocation3 + $0xdc8] sm:$0xff] }
 0x7a0   : > { %3726 = vmatprep.subr.bf16.mxu0 %v3725_v11  ;;  %v3743_v0 = vpack.c.bf16 %v2031_v39, %v2030_v38  ;;  %v2050_v11 = vld [vmem:[#allocation3 + $0xe60] sm:$0xff] }
 0x855   : > { %v1722_v41 = vpop.f32.mrb[16].mxu0 }
 0x856   : > { %v1723_v42 = vadd.f32 %v2330_v40, %v1722_v41  ;;  %v3107_v43 = vpop.f32.mrb[17].mxu0 }
 0x857   : > { %v2331_v43 = vld [vmem:[#allocation6 + $0x9] ss:$0 sm:$0xff] }
 0x858   : > { %v4224_v44 = vadd.f32 %v1723_v42, %v4200_v52  ;;  %v1930_v52 = vld [vmem:[#allocation3 + $0xd20] sm:$0xff] }
 0x859   : > { %v3708_v57 = vpack.c.bf16 %v1931_v56, %v1930_v52  ;;  %v3847_v56 = vld [vmem:[#allocation2] sm:$0xff] }
 0x85a   : > { %v1727_v45 = vmax.f32 %v4224_v44, 0.0 }
 0x85c   : > { %1728 = vst [vmem:[#allocation2 + $0x8] sm:$0xf] %v1727_v45 }
 0x863   : > { %v1730_v15 = vld [vmem:[#allocation2 + $0x8] sm:$0xf] }
 0x864   : > { %v1731_v51 = vld [vmem:[#allocation2 + $0x9] sm:$0xf]  ;;  %1849 = vmatprep.mubr.f32.mxu1 %v1730_v15 }
 0x865   : > { %v1729_v54 = vld [vmem:[#allocation2 + $0x7] sm:$0xf]  ;;  %3141 = vmatmul.mubr.f32.vlgmr.msra.gmra.mrb[18].mxu0 %v1731_v51 }
 0x866   : > { %1850 = vmatmul.mubr.f32.vlgmr.msra.gmra.mrb[14].mxu1 %v1729_v54  ;;  %3728 = vmatpush3.bf16.msra.mxu0 %v3727_v14  ;;  %v2056_v54 = vld [vmem:[#allocation3 + $0xe90] sm:$0xff]  ;;  %v3749_v14 = vpack.c.bf16 %v2051_v12, %v2050_v11 }
 0x867   : > { %3703 = vmatpush3.bf16.msra.mxu1 %v3702_v48  ;;  %3175 = vmatprep.mubr.msk.f32.mxu1 %vm3982_vm1, %v4176_v25  ;;  %v1936_v25 = vld [vmem:[#allocation3 + $0xd50] sm:$0xff]  ;;  %v2054_v48 = vld [vmem:[#allocation3 + $0xe80] sm:$0xff] }
 0x868   : > { %3704 = vmatprep.subr.bf16.mxu1 %v3981_v53  ;;  %v3717_v2 = vpack.c.bf16 %v1937_v1, %v1936_v25  ;;  %3730 = vmatprep.subr.bf16.mxu0 %v3729_v18  ;;  %v3758_v15 = vpack.c.bf16 %v2055_v49, %v2054_v48  ;;  %v2063_v25 = vld [vmem:[#allocation3 + $0xec8] sm:$0xff] }
 0x869   : > { %v2035_v18 = vld [vmem:[#allocation3 + $0xde8] sm:$0xff] }
 0x86a   : > { %3732 = vmatpush3.bf16.msra.mxu0 %v3731_v21  ;;  %v3751_v20 = vpack.c.bf16 %v2035_v18, %v2034_v17  ;;  %v2052_v21 = vld [vmem:[#allocation3 + $0xe70] sm:$0xff] }
 0x86b   : > { %3706 = vmatpush3.bf16.msra.mxu1 %v3705_v55  ;;  %3734 = vmatprep.subr.bf16.mxu0 %v3733_v24  ;;  %v2057_v55 = vld [vmem:[#allocation3 + $0xe98] sm:$0xff]  ;;  %v3753_v24 = vpack.c.bf16 %v2053_v22, %v2052_v21 }
 0x86c   : > { %3707 = vmatprep.subr.bf16.mxu1 %v3981_v53  ;;  %v3761_v52 = vpack.c.bf16 %v2057_v55, %v2056_v54 }
 0x86e   : > { %3736 = vmatpush3.bf16.msra.mxu0 %v3735_v28  ;;  %v2037_v28 = vld [vmem:[#allocation3 + $0xdf8] sm:$0xff] }
 0x86f   : > { %3709 = vmatpush3.bf16.msra.mxu1 %v3708_v57  ;;  %3738 = vmatprep.subr.bf16.mxu0 %v3737_v31  ;;  %v2058_v57 = vld [vmem:[#allocation3 + $0xea0] sm:$0xff]  ;;  %v3755_v30 = vpack.c.bf16 %v2037_v28, %v2036_v27  ;;  %v2332_v31 = vld [vmem:[#allocation6 + $0xa] ss:$0 sm:$0xff] }
 0x870   : > { %3710 = vmatprep.subr.bf16.mxu1 %v3981_v53  ;;  %v3764_v59 = vpack.c.bf16 %v2059_v58, %v2058_v57 }
 0x872   : > { %3740 = vmatpush3.bf16.msra.mxu0 %v3739_v34 }
 0x873   : > { %3712 = vmatpush3.bf16.msra.mxu1 %v3711_v60  ;;  %3742 = vmatprep.subr.bf16.mxu0 %v3741_v37  ;;  %v2060_v60 = vld [vmem:[#allocation3 + $0xeb0] sm:$0xff] }
 0x874   : > { %3713 = vmatprep.subr.bf16.mxu1 %v3981_v53  ;;  %v3767_v62 = vpack.c.bf16 %v2061_v61, %v2060_v60 }
 0x876   : > { %3744 = vmatpush3.bf16.msra.mxu0 %v3743_v0 }
 0x877   : > { %3715 = vmatpush3.bf16.msra.mxu1 %v3714_v63  ;;  %v2062_v63 = vld [vmem:[#allocation3 + $0xec0] sm:$0xff] }
 0x878   : > { %3716 = vmatprep.subr.bf16.mxu1 %v3981_v53  ;;  %v3770_v1 = vpack.c.bf16 %v2063_v25, %v2062_v63 }
 0x87b   : > { %3718 = vmatpush3.bf16.msra.mxu1 %v3717_v2  ;;  %v2048_v2 = vld [vmem:[#allocation3 + $0xe50] sm:$0xff] }
 0x87c   : > { %3719 = vmatprep.subr.bf16.mxu1 %v3981_v53 }
 0x87f   : > { %3721 = vmatpush3.bf16.msra.mxu1 %v3720_v5  ;;  %v3745_v5 = vpack.c.bf16 %v2049_v3, %v2048_v2 }
 0x880   : > { %3722 = vmatprep.subr.bf16.mxu1 %v3981_v53 }
 0x881   : > { %3746 = vmatprep.subr.bf16.mxu0 %v3745_v5 }
 0x883   : > { %3724 = vmatpush3.bf16.msra.mxu1 %v3723_v8  ;;  %v2033_v8 = vld [vmem:[#allocation3 + $0xdd8] sm:$0xff] }
 0x884   : > { %3757 = vmatprep.subr.bf16.mxu1 %v3981_v53  ;;  %v3747_v10 = vpack.c.bf16 %v2033_v8, %v2032_v7 }
 0x886   : > { %3748 = vmatpush3.bf16.msra.mxu0 %v3747_v10 }
 0x887   : > { %3750 = vmatprep.subr.bf16.mxu0 %v3749_v14 }
 0x88a   : > { %3752 = vmatpush3.bf16.msra.mxu0 %v3751_v20 }
 0x88b   : > { %3754 = vmatprep.subr.bf16.mxu0 %v3753_v24 }
 0x88e   : > { %3756 = vmatpush3.bf16.msra.mxu0 %v3755_v30 }
 0x938   : > { %v1921_v40 = vpop.f32.mrb[18].mxu0 }
 0x939   : > { %v2774_v41 = vpop.f32.mrb[14].mxu1  ;;  %v3142_v42 = vpop.f32.mrb[19].mxu0 }
 0x93a   : > { %v2775_v45 = vpop.f32.mrb[15].mxu1 }
 0x93b   : > { %v2776_v46 = vadd.f32 %v2775_v45, %v2774_v41 }
 0x93d   : > { %v1852_v47 = vadd.f32 %v2776_v46, %v2331_v43 }
 0x93f   : > { %v1922_v50 = vadd.f32 %v1921_v40, %v1852_v47  ;;  %v2333_v40 = vld [vmem:[#allocation6 + $0xb] ss:$0 sm:$0xff] }
 0x941   : > { %v1925_v51 = vmax.f32 %v1922_v50, 0.0 }
 0x943   : > { %3176 = vmatmul.mubr.f32.vlgmr.msra.gmra.mrb[16].mxu1 %v1925_v51 }
 0x944   : > { %3759 = vmatpush3.bf16.msra.mxu1 %v3758_v15  ;;  %3210 = vmatprep.mubr.msk.f32.mxu1 %vm3982_vm1, %v3847_v56 }
 0x945   : > { %3760 = vmatprep.subr.bf16.mxu1 %v3981_v53 }
 0x948   : > { %3762 = vmatpush3.bf16.msra.mxu1 %v3761_v52 }
 0x949   : > { %3763 = vmatprep.subr.bf16.mxu1 %v3981_v53 }
 0x94c   : > { %3765 = vmatpush3.bf16.msra.mxu1 %v3764_v59 }
 0x94d   : > { %3766 = vmatprep.subr.bf16.mxu1 %v3981_v53 }
 0x950   : > { %3768 = vmatpush3.bf16.msra.mxu1 %v3767_v62 }
 0x951   : > { %3769 = vmatprep.subr.bf16.mxu1 %v3981_v53 }
 0x954   : > { %3771 = vmatpush3.bf16.msra.mxu1 %v3770_v1 }
 0x955   : > { %3772 = vmatprep.subr.bf16.mxu1 %v3981_v53 }
 0x958   : > { %3774 = vmatpush3.bf16.msra.mxu1 %v3773_v9 }
 0x959   : > { %3775 = vmatprep.subr.bf16.mxu1 %v3981_v53 }
 0x95c   : > { %3777 = vmatpush3.bf16.msra.mxu1 %v3776_v19 }
 0x95d   : > { %3778 = vmatprep.subr.bf16.mxu1 %v3981_v53 }
 0x960   : > { %3780 = vmatpush3.bf16.msra.mxu1 %v3779_v29 }
 0xa16   : > { %v2013_v32 = vpop.f32.mrb[16].mxu1 }
 0xa17   : > { %v2014_v33 = vadd.f32 %v2332_v31, %v2013_v32  ;;  %v3177_v34 = vpop.f32.mrb[17].mxu1 }
 0xa19   : > { %v2017_v35 = vadd.f32 %v2014_v33, %v4224_v44 }
 0xa1b   : > { %2018 = vst [vmem:[#allocation2 + $0x8] sm:$0xf] %v2017_v35 }
 0xa22   : > { %v2020_v36 = vld [vmem:[#allocation2 + $0x8] sm:$0xf] }
 0xa23   : > { %v2021_v37 = vld [vmem:[#allocation2 + $0x9] sm:$0xf]  ;;  %2139 = vmatprep.mubr.f32.mxu0 %v2020_v36 }
 0xa24   : > { %v2019_v38 = vld [vmem:[#allocation2 + $0x7] sm:$0xf]  ;;  %3211 = vmatmul.mubr.f32.vlgmr.msra.gmra.mrb[18].mxu1 %v2021_v37 }
 0xa25   : > { %2140 = vmatmul.mubr.f32.vlgmr.msra.gmra.mrb[20].mxu0 %v2019_v38 }
 0xaf7   : > { %v2211_v53 = vpop.f32.mrb[18].mxu1 }
 0xaf8   : > { %v2843_v39 = vpop.f32.mrb[20].mxu0  ;;  %v3212_v0 = vpop.f32.mrb[19].mxu1 }
 0xaf9   : > { %v2844_v41 = vpop.f32.mrb[21].mxu0 }
 0xafa   : > { %v2845_v42 = vadd.f32 %v2844_v41, %v2843_v39 }
 0xafc   : > { %v2142_v44 = vadd.f32 %v2845_v42, %v2333_v40 }
 0xafe   : > { %v2212_v43 = vadd.f32 %v2211_v53, %v2142_v44 }
 0xb00   : > { %2215 = vst [vmem:[%s193_s25] sm:$0xf] %v2212_v43 }
 0xb01   : > { %3917 = shalt.err (!%p3914_p11)
}
 0xb02   : > { %s3918_s9 = scalar_lea.hbm %s4251_s5, 64  ;;  %s3922_s29 = scalar_lea.hbm %s4296_s3, 128 }
 0xb03   : > { %p3919_p13 = scmp.ne.s32.totalorder %s4251_s5, %s3918_s9  ;;  %p3923_p6 = scmp.lt.u32.totalorder %s4251_s5, %s4296_s3 }
 0xb04   : > { %p3924_p9 = scmp.lt.u32.totalorder %s3922_s29, %s3918_s9  ;;  %p3926_p10 = scmp.lt.u32.totalorder %s3918_s9, %s4251_s5 }
 0xb05   : > { %p3920_p5 = pnand %p3919_p13, %p4309_p1 }
 0xb06   : > { %p3925_p12 = por %p3924_p9, %p3923_p6 }
 0xb07   : > { %p3921_p0 = pneg %p3920_p5 }
 0xb08   : > { %p3927_p2 = por %p3926_p10, %p3925_p12 }
 0xb0a   : > { %p3928_p3 = pnand %p3927_p2, %p3921_p0 }
 0xb0c   : > { %3931 = shalt.err (!%p3928_p3)
}
 0xb0d   : > { %3789 = dma.vmem_to_hbm [thread:$0]  (%p4309_p1), %s4253_s28, 64, %s4251_s5, %s2217_s6  }
 0xb0e PF: > { %p3806_p4 = scmp.ge.s32.totalorder %s3974_s15, 2  ;;  %s2242_s17 = sand.u32 1, %s3962_s12  }
 0xb0f   : > { %p4310_p7 = scmp.ne.s32.totalorder %s4301_s23, 0  ;;  %s2243_s19 = scalar_lea.sflag [#allocation5], %s2242_s17 }
 0xb11   : > { %p3799_p8 = pnand %p3806_p4, %p4310_p7 }
 0xb13   : > { %3957 = dma.done.wait (!%p3799_p8), %s2243_s19, 64  }
 0xb14   : > { %3959 = vsyncadd (!%p3799_p8), %s2243_s19, 4294967232  ;;  %p15_p11 = scmp.ge.s32.totalorder %s4029_s18, 4   ;;  %s4311_s12 = smov %s3966_s13 }
 0xb15   : > { %s4312_s13 = smov %s3970_s14  ;;  %s4313_s14 = smov %s4040_s21 }
 0xb16   : > { %s4314_s15 = smov %s4029_s18  ;;  %17 = sbr.rel (!%p15_p11) target bundleno = 5 (0x5), region = 80 }
 0xb1d   :  { %2248 = vsyncpa [#allocation4], 1 }
 0xb1e   :  { %2250 = vsyncpa [#allocation4 + $0x1], 1 }
 0xb1f   :  { %2251 = vsyncpa [#allocation7], 1 }
 0xb20   :  { %2252 = vsyncpa [#allocation5], 1 }
 0xb21   :  { %2254 = vsyncpa [#allocation5 + $0x1], 1 }

</bundles_post_ra>
